<compile_context>
chip_gen: v7x
topology: tpu7x:2x2x1
jax: 0.10.0
libtpu: 0.0.40
codegen_flags: <defaults>
</compile_context>

<pallas_src>
import functools

import jax
import jax.numpy as jnp
import numpy as np
from jax.experimental import pallas as pl
from jax.experimental.pallas import tpu as pltpu

_P = jax.lax.Precision.HIGHEST


# ----------------------------- fused kernel -------------------------------- #

def _fused_mha_kernel(x_ref, wqkv_ref, wo_ref, o_ref, *, h, t, e, dk, dv, m,
                      precision):
    """One batch element end-to-end: packed QKV -> quirky attention -> out proj.

    x_ref    : (1, t, e)
    wqkv_ref : (e, 2*h*dk + h*dv)   columns = [WQperm heads | WK heads | WV heads]
    wo_ref   : (h*dv, e)
    o_ref    : (1, t, e)
    """
    f32 = jnp.float32
    x = x_ref[0]                                                    # (t, e)

    # One wide, lane-dense projection for all heads and all of Q/K/V.
    qkv = jnp.dot(x, wqkv_ref[...], precision=precision,
                  preferred_element_type=f32)                       # (t, 2*h*dk + h*dv)

    inv_scale = 1.0 / (float(t) ** 0.5)                             # / K.size(1)**0.5

    z_heads = []
    for hh in range(h):
        qp = qkv[:, hh * dk:(hh + 1) * dk]                          # column-permuted Q
        k = qkv[:, h * dk + hh * dk: h * dk + (hh + 1) * dk]        # K (natural layout)
        v = qkv[:, 2 * h * dk + hh * dv: 2 * h * dk + (hh + 1) * dv]

        # scores = Q @ K.view(e, t)  (row-major reshape quirk).  With e = m*t:
        #   scores = sum_s Q[:, s::m] @ K[:, s*t:(s+1)*t]
        # and Q[:, s::m] == Qperm[:, s*t:(s+1)*t] since the column permutation was
        # folded into WQ on the host -> pure contiguous block matmuls, no relayout.
        scores = jnp.zeros((t, t), f32)
        for s in range(m):
            scores += jnp.dot(qp[:, s * t:(s + 1) * t],
                              k[:, s * t:(s + 1) * t],
                              precision=precision, preferred_element_type=f32)
        scores = scores * inv_scale

        # nn.Softmax(1) on (b, t, t) -> softmax over the QUERY axis (axis 0 here).
        mx = jnp.max(scores, axis=0, keepdims=True)
        ex = jnp.exp(scores - mx)
        denom = jnp.sum(ex, axis=0, keepdims=True)
        a = ex * pl.reciprocal(denom, approx=False)                 # EUP, exact
        z_heads.append(jnp.dot(a, v, precision=precision,
                               preferred_element_type=f32))         # (t, dv)

    # Zt quirk: Z (h, t, dv) raw-reshaped to (t, h*dv), i.e. with
    # Zstack = concat_h(Z_h) (shape (h*t, dv)):
    #   Zt[:, kk*dv:(kk+1)*dv] = Zstack[kk::h, :]
    # Implemented with tiny exact 0/1 selection matmuls to stay in registers.
    zstack = jnp.concatenate(z_heads, axis=0)                       # (h*t, dv)
    out_row = jax.lax.broadcasted_iota(jnp.int32, (t, h * t), 0)
    stk_row = jax.lax.broadcasted_iota(jnp.int32, (t, h * t), 1)
    zt_blocks = []
    for kk in range(h):
        sel = (stk_row == out_row * h + kk).astype(f32)             # (t, h*t) 0/1
        zt_blocks.append(jnp.dot(sel, zstack, precision=precision,
                                 preferred_element_type=f32))       # (t, dv)
    zt = jnp.concatenate(zt_blocks, axis=1)                         # (t, h*dv)

    # Output projection.
    o_ref[0, :, :] = jnp.dot(zt, wo_ref[...], precision=precision,
                             preferred_element_type=f32)


# ------------------------------- wrapper ------------------------------------ #

def multi_head_attention(x, WQ, WK, WV, WO, *, precision=_P):
    b, t, e = x.shape
    h, e_w, dk = WQ.shape
    dv = WV.shape[-1]
    assert e_w == e
    assert dk == e, "the K.view(b, e, t) quirk requires dk == embed_dim"
    # TODO(synk): general embed_dim % num_tokens != 0 case needs an element-level
    # shuffle of K; the fused path assumes divisibility (holds for this module config).
    assert e % t == 0, "fused kernel requires embed_dim % num_tokens == 0"
    m = e // t

    f32 = jnp.float32
    x = x.astype(f32)
    WQ, WK, WV, WO = (WQ.astype(f32), WK.astype(f32), WV.astype(f32), WO.astype(f32))

    # Fold the K.view quirk's column permutation into WQ (exact):
    #   perm[s*t + r] = r*m + s   so   Qperm[:, s*t + r] = Q[:, r*m + s].
    perm = np.arange(e).reshape(t, m).T.reshape(-1)
    WQp = WQ[:, :, perm]

    # Pack all heads of Qperm/K/V into one (e, N) weight -> single wide matmul/batch.
    wq_flat = jnp.transpose(WQp, (1, 0, 2)).reshape(e, h * dk)
    wk_flat = jnp.transpose(WK, (1, 0, 2)).reshape(e, h * dk)
    wv_flat = jnp.transpose(WV, (1, 0, 2)).reshape(e, h * dv)
    w_qkv = jnp.concatenate([wq_flat, wk_flat, wv_flat], axis=1)    # (e, 2*h*dk + h*dv)
    n_all = 2 * h * dk + h * dv

    kernel = functools.partial(_fused_mha_kernel, h=h, t=t, e=e, dk=dk, dv=dv,
                               m=m, precision=precision)

    return pl.pallas_call(
        kernel,
        out_shape=jax.ShapeDtypeStruct((b, t, e), f32),
        grid=(b,),
        in_specs=[
            pl.BlockSpec((1, t, e), lambda i: (i, 0, 0)),           # x: one batch row
            pl.BlockSpec((e, n_all), lambda i: (0, 0)),             # packed QKV weights
            pl.BlockSpec((h * dv, e), lambda i: (0, 0)),            # WO
        ],
        out_specs=pl.BlockSpec((1, t, e), lambda i: (i, 0, 0)),
        compiler_params=pltpu.CompilerParams(
            dimension_semantics=("parallel",)),                     # batch across TCs
    )(x, w_qkv, WO)


# ------------------------------ reference ----------------------------------- #

def _reference(x, WQ, WK, WV, WO):
    """Pure-JAX mirror of the PyTorch forward (same quirks), f32 HIGHEST."""
    b, t, e = x.shape
    h = WQ.shape[0]
    dv = WV.shape[-1]
    zs = []
    for hh in range(h):
        Q = jnp.matmul(x, WQ[hh], precision=_P)
        K = jnp.matmul(x, WK[hh], precision=_P)
        V = jnp.matmul(x, WV[hh], precision=_P)
        Kr = K.reshape(b, e, t)                        # .view(b, e, t)
        scores = jnp.matmul(Q, Kr, precision=_P) / (float(t) ** 0.5)
        A = jax.nn.softmax(scores, axis=1)             # nn.Softmax(1)
        zs.append(jnp.matmul(A, V, precision=_P))
    Z = jnp.stack(zs, axis=1)                          # (b, H, t, dv)
    Zt = Z.reshape(b, t, h * dv)                       # raw reshape
    return jnp.matmul(Zt, WO, precision=_P)


# -------------------------------- main --------------------------------------- #

if __name__ == "__main__":
    B, H, T, E = 2, 2, 8, 32
    DK = DV = E

    key = jax.random.PRNGKey(0)
    kx, kq, kk, kv, ko = jax.random.split(key, 5)
    scale = 1.0 / jnp.sqrt(jnp.float32(E))             # keep logits in a sane range
    x = jax.random.normal(kx, (B, T, E), jnp.float32)
    WQ = jax.random.normal(kq, (H, E, DK), jnp.float32) * scale
    WK = jax.random.normal(kk, (H, E, DK), jnp.float32) * scale
    WV = jax.random.normal(kv, (H, E, DV), jnp.float32) * scale
    WO = jax.random.normal(ko, (H * DV, E), jnp.float32) * scale

    mha = jax.jit(multi_head_attention)
    out = jax.block_until_ready(mha(x, WQ, WK, WV, WO))

    ref = _reference(x, WQ, WK, WV, WO)
    assert out.shape == (B, T, E), out.shape
    assert jnp.allclose(out, ref, rtol=1e-3, atol=1e-3), \
        f"max abs diff {jnp.max(jnp.abs(out - ref))}"

    print("KERNEL_OK")
</pallas_src>

<mosaic_0001>
module attributes {stable_mosaic.version = 11 : i64} {
  func.func @_fused_mha_kernel(%arg0: i32, %arg1: memref<1x8x32xf32, #tpu.memory_space<vmem>>, %arg2: memref<32x192xf32, #tpu.memory_space<vmem>>, %arg3: memref<64x32xf32, #tpu.memory_space<vmem>>, %arg4: memref<1x8x32xf32, #tpu.memory_space<vmem>>) attributes {dimension_semantics = [#tpu.dimension_semantics<parallel>], iteration_bounds = array<i64: 2>, scalar_prefetch = 0 : i64, scratch_operands = 0 : i64, tpu.core_type = #tpu.core_type<tc>, window_params = [{transform_indices = @transform_0, window_bounds = array<i64: 1, 8, 32>}, {pipeline_mode = #tpu.pipeline_mode<synchronous>, transform_indices = @transform_1, window_bounds = array<i64: 32, 192>}, {pipeline_mode = #tpu.pipeline_mode<synchronous>, transform_indices = @transform_2, window_bounds = array<i64: 64, 32>}, {transform_indices = @transform_3, window_bounds = array<i64: 1, 8, 32>}]} {
    %c0 = arith.constant 0 : index
    %c0_0 = arith.constant 0 : index
    %c0_1 = arith.constant 0 : index
    %0 = vector.load %arg1[%c0, %c0_0, %c0_1] : memref<1x8x32xf32, #tpu.memory_space<vmem>>, vector<1x8x32xf32>
    %1 = vector.shape_cast %0 : vector<1x8x32xf32> to vector<8x32xf32>
    %c0_2 = arith.constant 0 : index
    %c0_3 = arith.constant 0 : index
    %2 = vector.load %arg2[%c0_2, %c0_3] : memref<32x192xf32, #tpu.memory_space<vmem>>, vector<32x192xf32>
    %cst = arith.constant dense<0.000000e+00> : vector<8x192xf32>
    %3 = tpu.matmul %1, %2, %cst {dimension_numbers = #tpu.dot_dimension_numbers<[1], [0], [0], [1], [0, 0, 1, 1], [], []>, precision = #tpu.contract_precision<fp32>} : vector<8x32xf32>, vector<32x192xf32>, vector<8x192xf32> -> vector<8x192xf32>
    %4 = vector.extract_strided_slice %3 {offsets = [0, 0], sizes = [8, 32], strides = [1, 1]} : vector<8x192xf32> to vector<8x32xf32>
    %5 = vector.extract_strided_slice %3 {offsets = [0, 64], sizes = [8, 32], strides = [1, 1]} : vector<8x192xf32> to vector<8x32xf32>
    %6 = vector.extract_strided_slice %3 {offsets = [0, 128], sizes = [8, 32], strides = [1, 1]} : vector<8x192xf32> to vector<8x32xf32>
    %cst_4 = arith.constant 0.000000e+00 : f32
    %7 = vector.broadcast %cst_4 : f32 to vector<8x8xf32>
    %8 = vector.extract_strided_slice %4 {offsets = [0, 0], sizes = [8, 8], strides = [1, 1]} : vector<8x32xf32> to vector<8x8xf32>
    %9 = vector.extract_strided_slice %5 {offsets = [0, 0], sizes = [8, 8], strides = [1, 1]} : vector<8x32xf32> to vector<8x8xf32>
    %cst_5 = arith.constant dense<0.000000e+00> : vector<8x8xf32>
    %10 = tpu.matmul %8, %9, %cst_5 {dimension_numbers = #tpu.dot_dimension_numbers<[1], [0], [0], [1], [0, 0, 1, 1], [], []>, precision = #tpu.contract_precision<fp32>} : vector<8x8xf32>, vector<8x8xf32>, vector<8x8xf32> -> vector<8x8xf32>
    %11 = arith.addf %7, %10 : vector<8x8xf32>
    %12 = vector.extract_strided_slice %4 {offsets = [0, 8], sizes = [8, 8], strides = [1, 1]} : vector<8x32xf32> to vector<8x8xf32>
    %13 = vector.extract_strided_slice %5 {offsets = [0, 8], sizes = [8, 8], strides = [1, 1]} : vector<8x32xf32> to vector<8x8xf32>
    %cst_6 = arith.constant dense<0.000000e+00> : vector<8x8xf32>
    %14 = tpu.matmul %12, %13, %cst_6 {dimension_numbers = #tpu.dot_dimension_numbers<[1], [0], [0], [1], [0, 0, 1, 1], [], []>, precision = #tpu.contract_precision<fp32>} : vector<8x8xf32>, vector<8x8xf32>, vector<8x8xf32> -> vector<8x8xf32>
    %15 = arith.addf %11, %14 : vector<8x8xf32>
    %16 = vector.extract_strided_slice %4 {offsets = [0, 16], sizes = [8, 8], strides = [1, 1]} : vector<8x32xf32> to vector<8x8xf32>
    %17 = vector.extract_strided_slice %5 {offsets = [0, 16], sizes = [8, 8], strides = [1, 1]} : vector<8x32xf32> to vector<8x8xf32>
    %cst_7 = arith.constant dense<0.000000e+00> : vector<8x8xf32>
    %18 = tpu.matmul %16, %17, %cst_7 {dimension_numbers = #tpu.dot_dimension_numbers<[1], [0], [0], [1], [0, 0, 1, 1], [], []>, precision = #tpu.contract_precision<fp32>} : vector<8x8xf32>, vector<8x8xf32>, vector<8x8xf32> -> vector<8x8xf32>
    %19 = arith.addf %15, %18 : vector<8x8xf32>
    %20 = vector.extract_strided_slice %4 {offsets = [0, 24], sizes = [8, 8], strides = [1, 1]} : vector<8x32xf32> to vector<8x8xf32>
    %21 = vector.extract_strided_slice %5 {offsets = [0, 24], sizes = [8, 8], strides = [1, 1]} : vector<8x32xf32> to vector<8x8xf32>
    %cst_8 = arith.constant dense<0.000000e+00> : vector<8x8xf32>
    %22 = tpu.matmul %20, %21, %cst_8 {dimension_numbers = #tpu.dot_dimension_numbers<[1], [0], [0], [1], [0, 0, 1, 1], [], []>, precision = #tpu.contract_precision<fp32>} : vector<8x8xf32>, vector<8x8xf32>, vector<8x8xf32> -> vector<8x8xf32>
    %23 = arith.addf %19, %22 : vector<8x8xf32>
    %cst_9 = arith.constant 0.353553385 : f32
    %24 = vector.broadcast %cst_9 : f32 to vector<8x8xf32>
    %25 = arith.mulf %23, %24 : vector<8x8xf32>
    %cst_10 = arith.constant dense<0xFF800000> : vector<8xf32>
    %26 = vector.multi_reduction <maximumf>, %25, %cst_10 [0] : vector<8x8xf32> to vector<8xf32>
    %27 = vector.shape_cast %26 : vector<8xf32> to vector<1x8xf32>
    %28 = vector.broadcast %27 : vector<1x8xf32> to vector<8x8xf32>
    %29 = arith.subf %25, %28 : vector<8x8xf32>
    %30 = math.exp %29 : vector<8x8xf32>
    %cst_11 = arith.constant dense<0.000000e+00> : vector<8xf32>
    %31 = vector.multi_reduction <add>, %30, %cst_11 [0] : vector<8x8xf32> to vector<8xf32>
    %32 = vector.shape_cast %31 : vector<8xf32> to vector<1x8xf32>
    %33 = tpu.reciprocal %32 : vector<1x8xf32> -> vector<1x8xf32>
    %34 = vector.broadcast %33 : vector<1x8xf32> to vector<8x8xf32>
    %35 = arith.mulf %30, %34 : vector<8x8xf32>
    %cst_12 = arith.constant dense<0.000000e+00> : vector<8x32xf32>
    %36 = tpu.matmul %35, %6, %cst_12 {dimension_numbers = #tpu.dot_dimension_numbers<[1], [0], [0], [1], [0, 0, 1, 1], [], []>, precision = #tpu.contract_precision<fp32>} : vector<8x8xf32>, vector<8x32xf32>, vector<8x32xf32> -> vector<8x32xf32>
    %37 = vector.extract_strided_slice %3 {offsets = [0, 32], sizes = [8, 32], strides = [1, 1]} : vector<8x192xf32> to vector<8x32xf32>
    %38 = vector.extract_strided_slice %3 {offsets = [0, 96], sizes = [8, 32], strides = [1, 1]} : vector<8x192xf32> to vector<8x32xf32>
    %39 = vector.extract_strided_slice %3 {offsets = [0, 160], sizes = [8, 32], strides = [1, 1]} : vector<8x192xf32> to vector<8x32xf32>
    %cst_13 = arith.constant 0.000000e+00 : f32
    %40 = vector.broadcast %cst_13 : f32 to vector<8x8xf32>
    %41 = vector.extract_strided_slice %37 {offsets = [0, 0], sizes = [8, 8], strides = [1, 1]} : vector<8x32xf32> to vector<8x8xf32>
    %42 = vector.extract_strided_slice %38 {offsets = [0, 0], sizes = [8, 8], strides = [1, 1]} : vector<8x32xf32> to vector<8x8xf32>
    %cst_14 = arith.constant dense<0.000000e+00> : vector<8x8xf32>
    %43 = tpu.matmul %41, %42, %cst_14 {dimension_numbers = #tpu.dot_dimension_numbers<[1], [0], [0], [1], [0, 0, 1, 1], [], []>, precision = #tpu.contract_precision<fp32>} : vector<8x8xf32>, vector<8x8xf32>, vector<8x8xf32> -> vector<8x8xf32>
    %44 = arith.addf %40, %43 : vector<8x8xf32>
    %45 = vector.extract_strided_slice %37 {offsets = [0, 8], sizes = [8, 8], strides = [1, 1]} : vector<8x32xf32> to vector<8x8xf32>
    %46 = vector.extract_strided_slice %38 {offsets = [0, 8], sizes = [8, 8], strides = [1, 1]} : vector<8x32xf32> to vector<8x8xf32>
    %cst_15 = arith.constant dense<0.000000e+00> : vector<8x8xf32>
    %47 = tpu.matmul %45, %46, %cst_15 {dimension_numbers = #tpu.dot_dimension_numbers<[1], [0], [0], [1], [0, 0, 1, 1], [], []>, precision = #tpu.contract_precision<fp32>} : vector<8x8xf32>, vector<8x8xf32>, vector<8x8xf32> -> vector<8x8xf32>
    %48 = arith.addf %44, %47 : vector<8x8xf32>
    %49 = vector.extract_strided_slice %37 {offsets = [0, 16], sizes = [8, 8], strides = [1, 1]} : vector<8x32xf32> to vector<8x8xf32>
    %50 = vector.extract_strided_slice %38 {offsets = [0, 16], sizes = [8, 8], strides = [1, 1]} : vector<8x32xf32> to vector<8x8xf32>
    %cst_16 = arith.constant dense<0.000000e+00> : vector<8x8xf32>
    %51 = tpu.matmul %49, %50, %cst_16 {dimension_numbers = #tpu.dot_dimension_numbers<[1], [0], [0], [1], [0, 0, 1, 1], [], []>, precision = #tpu.contract_precision<fp32>} : vector<8x8xf32>, vector<8x8xf32>, vector<8x8xf32> -> vector<8x8xf32>
    %52 = arith.addf %48, %51 : vector<8x8xf32>
    %53 = vector.extract_strided_slice %37 {offsets = [0, 24], sizes = [8, 8], strides = [1, 1]} : vector<8x32xf32> to vector<8x8xf32>
    %54 = vector.extract_strided_slice %38 {offsets = [0, 24], sizes = [8, 8], strides = [1, 1]} : vector<8x32xf32> to vector<8x8xf32>
    %cst_17 = arith.constant dense<0.000000e+00> : vector<8x8xf32>
    %55 = tpu.matmul %53, %54, %cst_17 {dimension_numbers = #tpu.dot_dimension_numbers<[1], [0], [0], [1], [0, 0, 1, 1], [], []>, precision = #tpu.contract_precision<fp32>} : vector<8x8xf32>, vector<8x8xf32>, vector<8x8xf32> -> vector<8x8xf32>
    %56 = arith.addf %52, %55 : vector<8x8xf32>
    %cst_18 = arith.constant 0.353553385 : f32
    %57 = vector.broadcast %cst_18 : f32 to vector<8x8xf32>
    %58 = arith.mulf %56, %57 : vector<8x8xf32>
    %cst_19 = arith.constant dense<0xFF800000> : vector<8xf32>
    %59 = vector.multi_reduction <maximumf>, %58, %cst_19 [0] : vector<8x8xf32> to vector<8xf32>
    %60 = vector.shape_cast %59 : vector<8xf32> to vector<1x8xf32>
    %61 = vector.broadcast %60 : vector<1x8xf32> to vector<8x8xf32>
    %62 = arith.subf %58, %61 : vector<8x8xf32>
    %63 = math.exp %62 : vector<8x8xf32>
    %cst_20 = arith.constant dense<0.000000e+00> : vector<8xf32>
    %64 = vector.multi_reduction <add>, %63, %cst_20 [0] : vector<8x8xf32> to vector<8xf32>
    %65 = vector.shape_cast %64 : vector<8xf32> to vector<1x8xf32>
    %66 = tpu.reciprocal %65 : vector<1x8xf32> -> vector<1x8xf32>
    %67 = vector.broadcast %66 : vector<1x8xf32> to vector<8x8xf32>
    %68 = arith.mulf %63, %67 : vector<8x8xf32>
    %cst_21 = arith.constant dense<0.000000e+00> : vector<8x32xf32>
    %69 = tpu.matmul %68, %39, %cst_21 {dimension_numbers = #tpu.dot_dimension_numbers<[1], [0], [0], [1], [0, 0, 1, 1], [], []>, precision = #tpu.contract_precision<fp32>} : vector<8x8xf32>, vector<8x32xf32>, vector<8x32xf32> -> vector<8x32xf32>
    %70 = tpu.concatenate %36, %69 in 0 : vector<8x32xf32>, vector<8x32xf32> -> vector<16x32xf32>
    %71 = tpu.iota {dimensions = array<i32: 0>} : vector<8x16xi32>
    %72 = tpu.iota {dimensions = array<i32: 1>} : vector<8x16xi32>
    %c2_i32 = arith.constant 2 : i32
    %73 = vector.broadcast %c2_i32 : i32 to vector<8x16xi32>
    %74 = arith.muli %71, %73 : vector<8x16xi32>
    %c0_i32 = arith.constant 0 : i32
    %75 = vector.broadcast %c0_i32 : i32 to vector<8x16xi32>
    %76 = arith.addi %74, %75 : vector<8x16xi32>
    %77 = arith.cmpi eq, %72, %76 : vector<8x16xi32>
    %78 = arith.extui %77 : vector<8x16xi1> to vector<8x16xi32>
    %79 = arith.sitofp %78 : vector<8x16xi32> to vector<8x16xf32>
    %cst_22 = arith.constant dense<0.000000e+00> : vector<8x32xf32>
    %80 = tpu.matmul %79, %70, %cst_22 {dimension_numbers = #tpu.dot_dimension_numbers<[1], [0], [0], [1], [0, 0, 1, 1], [], []>, precision = #tpu.contract_precision<fp32>} : vector<8x16xf32>, vector<16x32xf32>, vector<8x32xf32> -> vector<8x32xf32>
    %c2_i32_23 = arith.constant 2 : i32
    %81 = vector.broadcast %c2_i32_23 : i32 to vector<8x16xi32>
    %82 = arith.muli %71, %81 : vector<8x16xi32>
    %c1_i32 = arith.constant 1 : i32
    %83 = vector.broadcast %c1_i32 : i32 to vector<8x16xi32>
    %84 = arith.addi %82, %83 : vector<8x16xi32>
    %85 = arith.cmpi eq, %72, %84 : vector<8x16xi32>
    %86 = arith.extui %85 : vector<8x16xi1> to vector<8x16xi32>
    %87 = arith.sitofp %86 : vector<8x16xi32> to vector<8x16xf32>
    %cst_24 = arith.constant dense<0.000000e+00> : vector<8x32xf32>
    %88 = tpu.matmul %87, %70, %cst_24 {dimension_numbers = #tpu.dot_dimension_numbers<[1], [0], [0], [1], [0, 0, 1, 1], [], []>, precision = #tpu.contract_precision<fp32>} : vector<8x16xf32>, vector<16x32xf32>, vector<8x32xf32> -> vector<8x32xf32>
    %89 = tpu.concatenate %80, %88 in 1 : vector<8x32xf32>, vector<8x32xf32> -> vector<8x64xf32>
    %c0_25 = arith.constant 0 : index
    %c0_26 = arith.constant 0 : index
    %90 = vector.load %arg3[%c0_25, %c0_26] : memref<64x32xf32, #tpu.memory_space<vmem>>, vector<64x32xf32>
    %cst_27 = arith.constant dense<0.000000e+00> : vector<8x32xf32>
    %91 = tpu.matmul %89, %90, %cst_27 {dimension_numbers = #tpu.dot_dimension_numbers<[1], [0], [0], [1], [0, 0, 1, 1], [], []>, precision = #tpu.contract_precision<fp32>} : vector<8x64xf32>, vector<64x32xf32>, vector<8x32xf32> -> vector<8x32xf32>
    %c0_28 = arith.constant 0 : index
    %c0_29 = arith.constant 0 : index
    %c0_30 = arith.constant 0 : index
    %92 = vector.load %arg4[%c0_28, %c0_29, %c0_30] : memref<1x8x32xf32, #tpu.memory_space<vmem>>, vector<1x8x32xf32>
    %93 = vector.shape_cast %92 : vector<1x8x32xf32> to vector<8x32xf32>
    %94 = vector.shape_cast %91 : vector<8x32xf32> to vector<1x8x32xf32>
    tpu.vector_store %arg4[%c0_28, %c0_29, %c0_30], %94 {strides = array<i32>} : memref<1x8x32xf32, #tpu.memory_space<vmem>>, vector<1x8x32xf32>,
    return
  }
  func.func @transform_0(%arg0: i32) -> (i32, i32, i32) {
    %c0_i32 = arith.constant 0 : i32
    %c0_i32_0 = arith.constant 0 : i32
    %c0_i32_1 = arith.constant 0 : i32
    return %arg0, %c0_i32, %c0_i32_0 : i32, i32, i32
  }
  func.func @transform_1(%arg0: i32) -> (i32, i32) {
    %c0_i32 = arith.constant 0 : i32
    %c0_i32_0 = arith.constant 0 : i32
    %c0_i32_1 = arith.constant 0 : i32
    return %c0_i32, %c0_i32_0 : i32, i32
  }
  func.func @transform_2(%arg0: i32) -> (i32, i32) {
    %c0_i32 = arith.constant 0 : i32
    %c0_i32_0 = arith.constant 0 : i32
    %c0_i32_1 = arith.constant 0 : i32
    return %c0_i32, %c0_i32_0 : i32, i32
  }
  func.func @transform_3(%arg0: i32) -> (i32, i32, i32) {
    %c0_i32 = arith.constant 0 : i32
    %c0_i32_0 = arith.constant 0 : i32
    %c0_i32_1 = arith.constant 0 : i32
    return %arg0, %c0_i32, %c0_i32_0 : i32, i32, i32
  }
}

</mosaic_0001>

<bundles_post_ra>
// kernel: multi_head_attention.1
= control target key start
LH: loop header
LB: loop body
LE: loop exit
PB: predicated region body
PF: predicated region fallthrough
CT: control target
= control target key end

     0   :  { %8 = vsyncpa [#allocation3], 0  ;;  %s8669_s0 = inlined_call_operand.vmem [shape: f32[2,8,32], index: 0, kind: input, shape index: {}]   ;;  %s8670_s1 = inlined_call_operand.vmem [shape: f32[32,192], index: 1, kind: input, shape index: {}]   ;;  %s8671_s2 = inlined_call_operand.vmem [shape: f32[64,32], index: 2, kind: input, shape index: {}]   ;;  %s8672_s3 = inlined_call_operand.hbm [shape: f32[2,8,32], index: 3, kind: output, shape index: {}]  }
   0x1   :  { %10 = vsyncpa [#allocation3 + $0x1], 0  ;;  %s8058_s12 = smov 0   ;;  %s8060_s13 = smov 0  }
   0x2   :  { %s8062_s14 = smov 0   ;;  %s8064_s15 = smov 0  }
   0x3 LB: > { %s8079_s16 = sadd.s32 4294967295, %s8017_s15   ;;  %s6857_s17 = sadd.s32 4294967294, %s8017_s15   ;;  %s8017_s15 = sphi %s8064_s15, %s8678_s15   ;;  %s8013_s14 = sphi %s8062_s14, %s8677_s14   ;;  %s8009_s13 = sphi %s8060_s13, %s8676_s13   ;;  %s8005_s12 = sphi %s8058_s12, %s8675_s12  }
   0x4   : > { %s8083_s18 = sadd.s32 1, %s8017_s15   ;;  %s91_s19 = sadd.s32 1, %s8013_s14 }
   0x5   : > { %s88_s20 = ssub.s32 %s8017_s15, %s8083_s18  ;;  %p101_p0 = scmp.ne.s32.totalorder %s8013_s14, %s8009_s13 }
   0x6   : > { %p89_p1 = scmp.eq.s32.totalorder %s88_s20, 0  ;;  %p102_p2 = scmp.eq.s32.totalorder %s8079_s16, 1 }
   0x7   : > { %p107_p3 = scmp.ne.s32.totalorder %s8009_s13, %s8005_s12  ;;  %p108_p4 = scmp.eq.s32.totalorder %s6857_s17, 1 }
   0x8   : > { %s8094_s21 = scalar_select %p89_p1, %s8013_s14, %s91_s19  }
   0x9   : > { %p8096_p5 = por %p102_p2, %p101_p0  ;;  %p8100_p6 = por %p108_p4, %p107_p3 }
   0xa   : > { %p6860_p7 = scmp.ge.s32.totalorder %s8017_s15, 1  ;;  %p139_p8 = scmp.lt.s32.totalorder %s8017_s15, 3 }
   0xc   : > { %p140_p9 = pnand %p6860_p7, %p139_p8 }
   0xd   : > { %v168_v0 = vld [vmem:[%s8670_s1 + $0x8] sm:$0xff] (!%p140_p9)  ;;  %v170_v1 = vld [vmem:[%s8670_s1 + $0x18] sm:$0xff] (!%p140_p9)  ;;  %v167_v2 = vld [vmem:[%s8670_s1] sm:$0xff] (!%p140_p9)  ;;  %p162_p10 = scmp.lt.s32.totalorder (!%p140_p9), %s8079_s16, 1  ;;  %vm175_vm0 = vcmask (!%p140_p9), 261120   ;;  %v8019_v9 = vmov (!%p140_p9), 0.0  }
   0xe   : > { %143 = sbr.rel (%p140_p9) target bundleno = 2327 (0x917), region = 32  ;;  %v179_v3 = vand.u32 (!%p140_p9), 4294901760, %v168_v0  ;;  %v183_v4 = vand.u32 (!%p140_p9), 4294901760, %v170_v1  ;;  %v169_v5 = vld [vmem:[%s8670_s1 + $0x10] sm:$0xff] (!%p140_p9)  ;;  %v181_v6 = vand.u32 (!%p140_p9), 4294901760, %v167_v2  ;;  %v172_v7 = vld [vmem:[%s8670_s1 + $0x28] sm:$0xff] (!%p140_p9)  ;;  %251 = vmatprep.mubr.f32.mxu0 (!%p140_p9), %v8019_v9  ;;  %7085 = vmatprep.subr.mxu1 (!%p140_p9), %v8019_v9 }
   0xf   : > { %v174_v8 = vld [vmem:[%s8670_s1 + $0x38] sm:$0xff] (!%p140_p9)  ;;  %v185_v10 = vand.u32 (!%p140_p9), 4294901760, %v169_v5  ;;  %v187_v11 = vand.u32 (!%p140_p9), 4294901760, %v172_v7  ;;  %v171_v13 = vld [vmem:[%s8670_s1 + $0x20] sm:$0xff] (!%p140_p9)  ;;  %v173_v14 = vld [vmem:[%s8670_s1 + $0x30] sm:$0xff] (!%p140_p9)  ;;  %vm8020_vm1 = vmmov (!%p140_p9), 0  }
  0x10   : > { %v191_v12 = vand.u32 (!%p140_p9), 4294901760, %v174_v8  ;;  %v8136_v15 = vpack.c.bf16 (!%p140_p9), %v183_v4, %v179_v3  ;;  %v8138_v16 = vsub.f32 (!%p140_p9), %v168_v0, %v179_v3  ;;  %v8140_v17 = vsub.f32 (!%p140_p9), %v170_v1, %v183_v4  ;;  %7087 = vmatprep.mubr.msk.f32.mxu1 (!%p140_p9), %vm8020_vm1, %v8019_v9  ;;  %s8021_s27 = smov (!%p140_p9), 64   ;;  %s8022_s28 = smov (!%p140_p9), 120  }
  0x11   : > { %v8142_v18 = vsub.f32 (!%p140_p9), %v167_v2, %v181_v6  ;;  %v8144_v19 = vpack.c.bf16 (!%p140_p9), %v185_v10, %v181_v6  ;;  %v8146_v20 = vsub.f32 (!%p140_p9), %v169_v5, %v185_v10  ;;  %v8150_v22 = vsub.f32 (!%p140_p9), %v172_v7, %v187_v11  ;;  %s8023_s29 = smov (!%p140_p9), 112   ;;  %s8024_s30 = smov (!%p140_p9), 56  }
  0x12   : > { %v8148_v21 = vpack.c.bf16 (!%p140_p9), %v191_v12, %v187_v11  ;;  %7584 = vmatprep.subr.bf16.mxu0 (!%p140_p9), %v8136_v15  ;;  %v8153_v23 = vsub.f32 (!%p140_p9), %v174_v8, %v191_v12  ;;  %v189_v24 = vand.u32 (!%p140_p9), 4294901760, %v171_v13  ;;  %v193_v25 = vand.u32 (!%p140_p9), 4294901760, %v173_v14  ;;  %s8025_s4 = smov (!%p140_p9), 104   ;;  %s8026_s5 = smov (!%p140_p9), 48  }
  0x13   : > { %v265_v26 = vand.u32 (!%p140_p9), 4294901760, %v8138_v16  ;;  %7586 = vmatpush1.bf16.msra.mxu0 (!%p140_p9), %v8144_v19  ;;  %v277_v28 = vand.u32 (!%p140_p9), 4294901760, %v8140_v17  ;;  %v271_v29 = vand.u32 (!%p140_p9), 4294901760, %v8142_v18  ;;  %v283_v30 = vand.u32 (!%p140_p9), 4294901760, %v8146_v20  ;;  %s8027_s6 = smov (!%p140_p9), 88   ;;  %s8028_s7 = smov (!%p140_p9), 40  }
  0x14   : > { %v289_v31 = vand.u32 (!%p140_p9), 4294901760, %v8150_v22  ;;  %7588 = vmatprep.subr.bf16.mxu0 (!%p140_p9), %v8148_v21  ;;  %v8165_v32 = vpack.c.bf16 (!%p140_p9), %v193_v25, %v189_v24  ;;  %v294_v33 = vsub.f32 (!%p140_p9), %v171_v13, %v189_v24  ;;  %v306_v34 = vsub.f32 (!%p140_p9), %v173_v14, %v193_v25  ;;  %s8029_s8 = smov (!%p140_p9), 96   ;;  %s8030_s9 = smov (!%p140_p9), 24  }
  0x15   : > { %s163_s19 = scalar_select %p162_p10, %s8079_s16, 1  ;;  %v266_v37 = vsub.f32 %v8138_v16, %v265_v26  ;;  %v278_v38 = vsub.f32 %v8140_v17, %v277_v28  ;;  %v272_v39 = vsub.f32 %v8142_v18, %v271_v29  ;;  %v284_v40 = vsub.f32 %v8146_v20, %v283_v30 }
  0x16   : > { %v290_v41 = vsub.f32 %v8150_v22, %v289_v31  ;;  %v301_v42 = vand.u32 4294901760, %v8153_v23  ;;  %v295_v43 = vand.u32 4294901760, %v294_v33  ;;  %v307_v54 = vand.u32 4294901760, %v306_v34  ;;  %s8031_s10 = smov 80   ;;  %s8032_s11 = smov 32  }
  0x17   : > { %s6862_s20 = sshll.u32 %s163_s19, 3  ;;  %7590 = vmatpush1.bf16.msra.mxu0 %v8165_v32  ;;  %v267_v45 = vand.u32 4294901760, %v266_v37  ;;  %v279_v46 = vand.u32 4294901760, %v278_v38  ;;  %v273_v47 = vand.u32 4294901760, %v272_v39  ;;  %v285_v48 = vand.u32 4294901760, %v284_v40  ;;  %s8033_s17 = smov 72  }
  0x18   : > { %s165_s26 = scalar_lea.vmem %s8669_s0, %s6862_s20  ;;  %v302_v49 = vsub.f32 %v8153_v23, %v301_v42  ;;  %v296_v50 = vsub.f32 %v294_v33, %v295_v43  ;;  %v291_v53 = vand.u32 4294901760, %v290_v41  ;;  %v308_v57 = vsub.f32 %v306_v34, %v307_v54  ;;  %s8034_s19 = smov 16  }
  0x19   : > { %v166_v27 = vld [vmem:[%s165_s26] sm:$0xff]  ;;  %v7591_v52 = vpack.c.bf16 %v279_v46, %v267_v45  ;;  %v7593_v58 = vpack.c.bf16 %v285_v48, %v273_v47  ;;  %v7599_v0 = vpack.c.bf16 %v8140_v17, %v8138_v16  ;;  %v7601_v1 = vpack.c.bf16 %v8146_v20, %v8142_v18  ;;  %s8035_s20 = smov 8   ;;  %s6872_s24 = sshll.u32 %s8079_s16, 7 }
  0x1a   : > { %v177_v35 = vsel %vm175_vm0, %v166_v27, 0  ;;  %v303_v55 = vand.u32 4294901760, %v302_v49  ;;  %v297_v59 = vand.u32 4294901760, %v296_v50  ;;  %v309_v62 = vand.u32 4294901760, %v308_v57  ;;  %s8037_s16 = smov [#allocation2]  }
  0x1b   : > { %v8168_v36 = vand.u32 4294901760, %v177_v35  ;;  %7592 = vmatprep.subr.bf16.mxu0 %v7591_v52  ;;  %v7603_v2 = vpack.c.bf16 %v8153_v23, %v8150_v22  ;;  %v7605_v3 = vpack.c.bf16 %v306_v34, %v294_v33  ;;  %v7615_v4 = vpack.c.bf16 %v277_v28, %v265_v26 }
  0x1c   : > { %v7595_v61 = vpack.c.bf16 %v303_v55, %v291_v53  ;;  %v7597_v63 = vpack.c.bf16 %v309_v62, %v297_v59  ;;  %v7617_v5 = vpack.c.bf16 %v283_v30, %v271_v29  ;;  %v7619_v6 = vpack.c.bf16 %v301_v42, %v289_v31 }
  0x1d   : > { %v253_v44 = vsub.f32 %v177_v35, %v8168_v36  ;;  %v7621_v7 = vpack.c.bf16 %v307_v54, %v295_v43  ;;  %vm728_vm2 = vcmask 64512   ;;  %vm5300_vm4 = vcmask 130048  }
  0x1e   : > { %vm6242_vm6 = vcmask 523264  }
  0x1f   : > { %v254_v51 = vand.u32 4294901760, %v253_v44 }
  0x21   : > { %v255_v56 = vsub.f32 %v253_v44, %v254_v51 }
  0x23   : > { %v256_v60 = vand.u32 4294901760, %v255_v56 }
  0x25   : > { %257 = vmatmul.mubr.f32.vlgmr.msra.gmra.mrb[0].mxu0 %v256_v60 }
  0x26   : > { %7594 = vmatpush1.bf16.msra.mxu0 %v7593_v58  ;;  %367 = vmatprep.mubr.f32.mxu0 %v8019_v9 }
  0x27   : > { %7596 = vmatprep.subr.bf16.mxu0 %v7595_v61 }
  0x2a   : > { %7598 = vmatpush1.bf16.msra.mxu0 %v7597_v63 }
  0x2b   : > { %7600 = vmatprep.subr.bf16.mxu0 %v7599_v0 }
  0x2d   : > { %369 = vmatmul.mubr.f32.vlgmr.msra.gmra.mrb[0].mxu0 %v8168_v36 }
  0x2e   : > { %7602 = vmatpush1.bf16.msra.mxu0 %v7601_v1  ;;  %455 = vmatprep.mubr.f32.mxu0 %v8019_v9 }
  0x2f   : > { %7604 = vmatprep.subr.bf16.mxu0 %v7603_v2 }
  0x32   : > { %7606 = vmatpush1.bf16.msra.mxu0 %v7605_v3 }
  0x33   : > { %7608 = vmatprep.subr.bf16.mxu0 %v8136_v15 }
  0x35   : > { %458 = vmatmul.mubr.f32.vlgmr.msra.gmra.mrb[0].mxu0 %v253_v44 }
  0x36   : > { %7610 = vmatpush1.bf16.msra.mxu0 %v8144_v19  ;;  %536 = vmatprep.mubr.f32.mxu0 %v8019_v9 }
  0x37   : > { %7612 = vmatprep.subr.bf16.mxu0 %v8148_v21 }
  0x3a   : > { %7614 = vmatpush1.bf16.msra.mxu0 %v8165_v32 }
  0x3b   : > { %7616 = vmatprep.subr.bf16.mxu0 %v7615_v4 }
  0x3d   : > { %540 = vmatmul.mubr.f32.vlgmr.msra.gmra.mrb[0].mxu0 %v254_v51 }
  0x3e   : > { %7618 = vmatpush1.bf16.msra.mxu0 %v7617_v5  ;;  %634 = vmatprep.mubr.f32.mxu0 %v8019_v9 }
  0x3f   : > { %7620 = vmatprep.subr.bf16.mxu0 %v7619_v6 }
  0x42   : > { %7622 = vmatpush1.bf16.msra.mxu0 %v7621_v7 }
  0x43   : > { %7624 = vmatprep.subr.bf16.mxu0 %v8136_v15 }
  0x45   : > { %636 = vmatmul.mubr.f32.vlgmr.msra.gmra.mrb[0].mxu0 %v8168_v36 }
  0x46   : > { %7626 = vmatpush1.bf16.msra.mxu0 %v8144_v19  ;;  %714 = vmatprep.mubr.f32.mxu0 %v8019_v9 }
  0x47   : > { %7628 = vmatprep.subr.bf16.mxu0 %v8148_v21 }
  0x4a   : > { %7630 = vmatpush1.bf16.msra.mxu0 %v8165_v32 }
  0x4b   : > { %7205 = vmatprep.subr.mxu0 %v8019_v9 }
  0x4d   : > { %716 = vmatmul.mubr.f32.vlgmr.msra.gmra.mrb[0].mxu0 %v8168_v36 }
  0x4e   : > { %7207 = vmatprep.mubr.msk.f32.mxu0 %vm8020_vm1, %v8019_v9 }
 0x120   : > { %v8206_v8 = vpop.f32.mrb[0].mxu0 }
 0x121   : > { %1177 = vrot.lane.b32.xlu1 %v8206_v8, %s8021_s27  ;;  %723 = vrot.lane.b32.xlu0 %v8206_v8, %s8022_s28  ;;  %v8210_v10 = vpop.f32.mrb[1].mxu0  ;;  %v1180_v25 = vsel %vm728_vm2, %v8206_v8, 0 }
 0x122   : > { %v8213_v11 = vand.u32 4294901760, %v8210_v10  ;;  %v1248_v27 = vand.u32 4294901760, %v1180_v25 }
 0x124   : > { %7206 = vmatpush3.msra.mxu0 %v8213_v11  ;;  %v1249_v29 = vsub.f32 %v1180_v25, %v1248_v27 }
 0x125   : > { %1628 = vrot.lane.b32.xlu1 %v8206_v8, %s8023_s29  ;;  %725 = vrot.lane.b32.xlu0 %v8206_v8, %s8024_s30  ;;  %s8626_s29 = scalar_lea.hbm %s8672_s3, %s6872_s24 }
 0x126   : > { %7210 = vmatprep.subr.mxu0 %v8019_v9  ;;  %v1250_v31 = vand.u32 4294901760, %v1249_v29 }
 0x128   : > { %v1251_v33 = vsub.f32 %v1249_v29, %v1250_v31 }
 0x129   : > { %2082 = vrot.lane.b32.xlu1 %v8206_v8, %s8025_s4  ;;  %1630 = vrot.lane.b32.xlu0 %v8206_v8, %s8026_s5  ;;  %s7959_s5 = sshll.u32 %s8037_s16, 4  ;;  %s7960_s5 = int_to_ptr.vmem [resolvable:$false] %s7959_s5 }
 0x12a   : > { %v1252_v35 = vand.u32 4294901760, %v1251_v33 }
 0x12d   : > { %3005 = vrot.lane.b32.xlu1 %v8206_v8, %s8027_s6  ;;  %2084 = vrot.lane.b32.xlu0 %v8206_v8, %s8028_s7  ;;  %s7961_s6 = scalar_lea.vmem %s7960_s5, 256 }
 0x131   : > { %3458 = vrot.lane.b32.xlu1 %v8206_v8, %s8029_s8  ;;  %3007 = vrot.lane.b32.xlu0 %v8206_v8, %s8030_s9 }
 0x135   : > { %3911 = vrot.lane.b32.xlu1 %v8206_v8, %s8031_s10  ;;  %3460 = vrot.lane.b32.xlu0 %v8206_v8, %s8032_s11 }
 0x139   : > { %4365 = vrot.lane.b32.xlu1 %v8206_v8, %s8033_s17  ;;  %3913 = vrot.lane.b32.xlu0 %v8206_v8, %s8034_s19 }
 0x13d   : > { %4367 = vrot.lane.b32.xlu0 %v8206_v8, %s8035_s20  ;;  %4840 = vrot.lane.b32.xlu1 %v8210_v10, %s8029_s8 }
 0x193   : > { %v724_v12 = vpop.permute.xlu0 %723  ;;  %v1178_v26 = vpop.permute.xlu1 %1177 }
 0x194   : > { %v729_v13 = vsel %vm728_vm2, %v724_v12, 0  ;;  %v1183_v28 = vand.u32 4294901760, %v1178_v26 }
 0x195   : > { %v797_v14 = vand.u32 4294901760, %v729_v13 }
 0x196   : > { %v1260_v30 = vsub.f32 %v1178_v26, %v1183_v28 }
 0x197   : > { %v798_v15 = vsub.f32 %v729_v13, %v797_v14  ;;  %v726_v16 = vpop.permute.xlu0 %725  ;;  %v1629_v37 = vpop.permute.xlu1 %1628 }
 0x198   : > { %v732_v17 = vand.u32 4294901760, %v726_v16  ;;  %v1261_v32 = vand.u32 4294901760, %v1260_v30  ;;  %v1633_v38 = vsel %vm728_vm2, %v1629_v37, 0 }
 0x199   : > { %v799_v18 = vand.u32 4294901760, %v798_v15  ;;  %v1701_v40 = vand.u32 4294901760, %v1633_v38 }
 0x19a   : > { %v809_v19 = vsub.f32 %v726_v16, %v732_v17  ;;  %7086 = vmatpush3.msra.mxu1 %v732_v17  ;;  %v1262_v34 = vsub.f32 %v1260_v30, %v1261_v32 }
 0x19b   : > { %v800_v20 = vsub.f32 %v798_v15, %v799_v18  ;;  %7090 = vmatprep.subr.mxu1 %v8019_v9  ;;  %v1631_v39 = vpop.permute.xlu0 %1630  ;;  %v1702_v42 = vsub.f32 %v1633_v38, %v1701_v40  ;;  %v2083_v50 = vpop.permute.xlu1 %2082 }
 0x19c   : > { %v810_v21 = vand.u32 4294901760, %v809_v19  ;;  %v1263_v36 = vand.u32 4294901760, %v1262_v34  ;;  %v1636_v41 = vand.u32 4294901760, %v1631_v39  ;;  %v2087_v51 = vsel %vm728_vm2, %v2083_v50, 0 }
 0x19d   : > { %v801_v22 = vand.u32 4294901760, %v800_v20  ;;  %v1703_v44 = vand.u32 4294901760, %v1702_v42  ;;  %v2155_v53 = vand.u32 4294901760, %v2087_v51 }
 0x19e   : > { %v811_v23 = vsub.f32 %v809_v19, %v810_v21  ;;  %v1713_v43 = vsub.f32 %v1631_v39, %v1636_v41 }
 0x19f   : > { %7088 = vmatmul.mubr.f32.vlgmr.msra.gmra.mrb[0].mxu1 %v801_v22  ;;  %v1704_v46 = vsub.f32 %v1702_v42, %v1703_v44  ;;  %v2085_v52 = vpop.permute.xlu0 %2084  ;;  %v2156_v55 = vsub.f32 %v2087_v51, %v2155_v53  ;;  %v8298_v63 = vpop.permute.xlu1 %3005 }
 0x1a0   : > { %v812_v24 = vand.u32 4294901760, %v811_v23  ;;  %7092 = vmatprep.mubr.msk.f32.mxu1 %vm8020_vm1, %v8019_v9  ;;  %v1714_v45 = vand.u32 4294901760, %v1713_v43  ;;  %v2090_v54 = vand.u32 4294901760, %v2085_v52 }
 0x1a1   : > { %v1705_v48 = vand.u32 4294901760, %v1704_v46  ;;  %v2157_v57 = vand.u32 4294901760, %v2156_v55 }
 0x1a2   : > { %7091 = vmatpush3.msra.mxu1 %v812_v24  ;;  %v1715_v47 = vsub.f32 %v1713_v43, %v1714_v45  ;;  %v2167_v56 = vsub.f32 %v2085_v52, %v2090_v54 }
 0x1a3   : > { %7095 = vmatprep.subr.mxu1 %v8019_v9  ;;  %v2158_v59 = vsub.f32 %v2156_v55, %v2157_v57  ;;  %v8302_v0 = vpop.permute.xlu1 %3458 }
 0x1a4   : > { %v1716_v49 = vand.u32 4294901760, %v1715_v47  ;;  %v2168_v58 = vand.u32 4294901760, %v2167_v56 }
 0x1a5   : > { %v2159_v61 = vand.u32 4294901760, %v2158_v59 }
 0x1a6   : > { %v2169_v60 = vsub.f32 %v2167_v56, %v2168_v58 }
 0x1a7   : > { %7093 = vmatmul.mubr.f32.vlgmr.msra.gmra.mrb[0].mxu1 %v797_v14  ;;  %v8305_v1 = vpop.permute.xlu1 %3911 }
 0x1a8   : > { %7096 = vmatpush3.msra.mxu1 %v809_v19  ;;  %7097 = vmatprep.mubr.msk.f32.mxu1 %vm8020_vm1, %v8019_v9  ;;  %v2170_v62 = vand.u32 4294901760, %v2169_v60 }
 0x1a9   : > { %7100 = vmatprep.subr.mxu1 %v8019_v9 }
 0x1ab   : > { %v8310_v2 = vpop.permute.xlu1 %4365 }
 0x1af   : > { %7098 = vmatmul.mubr.f32.vlgmr.msra.gmra.mrb[0].mxu1 %v798_v15  ;;  %v8315_v3 = vpop.permute.xlu1 %4840 }
 0x1b0   : > { %7101 = vmatpush3.msra.mxu1 %v732_v17  ;;  %7102 = vmatprep.mubr.msk.f32.mxu1 %vm8020_vm1, %v8019_v9  ;;  %v8318_v4 = vand.u32 4294901760, %v8315_v3 }
 0x1b1   : > { %7105 = vmatprep.subr.mxu1 %v8019_v9 }
 0x1b7   : > { %7103 = vmatmul.mubr.f32.vlgmr.msra.gmra.mrb[0].mxu1 %v799_v18 }
 0x1b8   : > { %7106 = vmatpush3.msra.mxu1 %v810_v21  ;;  %7107 = vmatprep.mubr.msk.f32.mxu1 %vm8020_vm1, %v8019_v9 }
 0x1b9   : > { %7110 = vmatprep.subr.mxu1 %v8019_v9 }
 0x1bf   : > { %7108 = vmatmul.mubr.f32.vlgmr.msra.gmra.mrb[0].mxu1 %v797_v14 }
 0x1c0   : > { %7111 = vmatpush3.msra.mxu1 %v732_v17  ;;  %7112 = vmatprep.mubr.msk.f32.mxu1 %vm8020_vm1, %v8019_v9 }
 0x1c1   : > { %7115 = vmatprep.subr.mxu1 %v8019_v9 }
 0x1c7   : > { %7113 = vmatmul.mubr.f32.vlgmr.msra.gmra.mrb[0].mxu1 %v797_v14 }
 0x1c8   : > { %7116 = vmatpush3.msra.mxu1 %v1183_v28  ;;  %7117 = vmatprep.mubr.msk.f32.mxu1 %vm8020_vm1, %v8019_v9 }
 0x1c9   : > { %7120 = vmatprep.subr.mxu1 %v8019_v9 }
 0x1cf   : > { %7118 = vmatmul.mubr.f32.vlgmr.msra.gmra.mrb[0].mxu1 %v1252_v35 }
 0x1d0   : > { %7121 = vmatpush3.msra.mxu1 %v1263_v36  ;;  %7122 = vmatprep.mubr.msk.f32.mxu1 %vm8020_vm1, %v8019_v9 }
 0x1d1   : > { %7125 = vmatprep.subr.mxu1 %v8019_v9 }
 0x1d7   : > { %7123 = vmatmul.mubr.f32.vlgmr.msra.gmra.mrb[0].mxu1 %v1248_v27 }
 0x1d8   : > { %7126 = vmatpush3.msra.mxu1 %v1260_v30  ;;  %7127 = vmatprep.mubr.msk.f32.mxu1 %vm8020_vm1, %v8019_v9 }
 0x1d9   : > { %7130 = vmatprep.subr.mxu1 %v8019_v9 }
 0x1df   : > { %7128 = vmatmul.mubr.f32.vlgmr.msra.gmra.mrb[0].mxu1 %v1249_v29  ;;  %v2637_v29 = vsub.f32 %v8210_v10, %v8213_v11  ;;  %v3010_v10 = vsel %vm728_vm2, %v8298_v63, 0 }
 0x1e0   : > { %7131 = vmatpush3.msra.mxu1 %v1183_v28  ;;  %7132 = vmatprep.mubr.msk.f32.mxu1 %vm8020_vm1, %v8019_v9 }
 0x1e1   : > { %7135 = vmatprep.subr.mxu1 %v8019_v9  ;;  %v2638_v33 = vand.u32 4294901760, %v2637_v29 }
 0x1e3   : > { %v2639_v36 = vsub.f32 %v2637_v29, %v2638_v33 }
 0x1e5   : > { %v2640_v39 = vand.u32 4294901760, %v2639_v36 }
 0x1e7   : > { %7133 = vmatmul.mubr.f32.vlgmr.msra.gmra.mrb[0].mxu1 %v1250_v31 }
 0x1e8   : > { %7136 = vmatpush3.msra.mxu1 %v1261_v32  ;;  %7137 = vmatprep.mubr.msk.f32.mxu1 %vm8020_vm1, %v8019_v9 }
 0x1e9   : > { %7140 = vmatprep.subr.mxu1 %v8019_v9 }
 0x1ef   : > { %7138 = vmatmul.mubr.f32.vlgmr.msra.gmra.mrb[0].mxu1 %v1248_v27 }
 0x1f0   : > { %7141 = vmatpush3.msra.mxu1 %v1183_v28  ;;  %7142 = vmatprep.mubr.msk.f32.mxu1 %vm8020_vm1, %v8019_v9 }
 0x1f1   : > { %7145 = vmatprep.subr.mxu1 %v8019_v9 }
 0x1f7   : > { %7143 = vmatmul.mubr.f32.vlgmr.msra.gmra.mrb[0].mxu1 %v1248_v27 }
 0x1f8   : > { %7146 = vmatpush3.msra.mxu1 %v1636_v41  ;;  %7147 = vmatprep.mubr.msk.f32.mxu1 %vm8020_vm1, %v8019_v9 }
 0x1f9   : > { %7150 = vmatprep.subr.mxu1 %v8019_v9 }
 0x1ff   : > { %7148 = vmatmul.mubr.f32.vlgmr.msra.gmra.mrb[0].mxu1 %v1705_v48 }
 0x200   : > { %7151 = vmatpush3.msra.mxu1 %v1716_v49  ;;  %7152 = vmatprep.mubr.msk.f32.mxu1 %vm8020_vm1, %v8019_v9 }
 0x201   : > { %7155 = vmatprep.subr.mxu1 %v8019_v9 }
 0x207   : > { %7153 = vmatmul.mubr.f32.vlgmr.msra.gmra.mrb[0].mxu1 %v1701_v40 }
 0x208   : > { %7156 = vmatpush3.msra.mxu1 %v1713_v43  ;;  %7157 = vmatprep.mubr.msk.f32.mxu1 %vm8020_vm1, %v8019_v9 }
 0x209   : > { %7160 = vmatprep.subr.mxu1 %v8019_v9 }
 0x20f   : > { %7158 = vmatmul.mubr.f32.vlgmr.msra.gmra.mrb[0].mxu1 %v1702_v42 }
 0x210   : > { %7161 = vmatpush3.msra.mxu1 %v1636_v41  ;;  %7162 = vmatprep.mubr.msk.f32.mxu1 %vm8020_vm1, %v8019_v9 }
 0x211   : > { %7165 = vmatprep.subr.mxu1 %v8019_v9 }
 0x217   : > { %7163 = vmatmul.mubr.f32.vlgmr.msra.gmra.mrb[0].mxu1 %v1703_v44 }
 0x218   : > { %7166 = vmatpush3.msra.mxu1 %v1714_v45  ;;  %7167 = vmatprep.mubr.msk.f32.mxu1 %vm8020_vm1, %v8019_v9 }
 0x219   : > { %7170 = vmatprep.subr.mxu1 %v8019_v9 }
 0x21f   : > { %7168 = vmatmul.mubr.f32.vlgmr.msra.gmra.mrb[0].mxu1 %v1701_v40 }
 0x220   : > { %7171 = vmatpush3.msra.mxu1 %v1636_v41  ;;  %7172 = vmatprep.mubr.msk.f32.mxu1 %vm8020_vm1, %v8019_v9  ;;  %v3078_v41 = vand.u32 4294901760, %v3010_v10 }
 0x221   : > { %7175 = vmatprep.subr.mxu1 %v8019_v9 }
 0x222   : > { %v3079_v43 = vsub.f32 %v3010_v10, %v3078_v41 }
 0x224   : > { %v3080_v45 = vand.u32 4294901760, %v3079_v43 }
 0x226   : > { %v3081_v47 = vsub.f32 %v3079_v43, %v3080_v45 }
 0x227   : > { %7173 = vmatmul.mubr.f32.vlgmr.msra.gmra.mrb[0].mxu1 %v1701_v40  ;;  %v3008_v40 = vpop.permute.xlu0 %3007 }
 0x228   : > { %7176 = vmatpush3.msra.mxu1 %v2090_v54  ;;  %7177 = vmatprep.mubr.msk.f32.mxu1 %vm8020_vm1, %v8019_v9  ;;  %v3013_v42 = vand.u32 4294901760, %v3008_v40  ;;  %v3082_v49 = vand.u32 4294901760, %v3081_v47 }
 0x229   : > { %7180 = vmatprep.subr.mxu1 %v8019_v9 }
 0x22a   : > { %v3090_v44 = vsub.f32 %v3008_v40, %v3013_v42 }
 0x22b   : > { %v3461_v51 = vpop.permute.xlu0 %3460 }
 0x22c   : > { %v3091_v46 = vand.u32 4294901760, %v3090_v44 }
 0x22e   : > { %v3092_v48 = vsub.f32 %v3090_v44, %v3091_v46 }
 0x22f   : > { %7178 = vmatmul.mubr.f32.vlgmr.msra.gmra.mrb[0].mxu1 %v2159_v61  ;;  %v3914_v63 = vpop.permute.xlu0 %3913 }
 0x230   : > { %7181 = vmatpush3.msra.mxu1 %v2170_v62  ;;  %7182 = vmatprep.mubr.msk.f32.mxu1 %vm8020_vm1, %v8019_v9  ;;  %v3093_v50 = vand.u32 4294901760, %v3092_v48  ;;  %v3916_v62 = vsel %vm728_vm2, %v8305_v1, 0 }
 0x231   : > { %7185 = vmatprep.subr.mxu1 %v8019_v9 }
 0x237   : > { %7183 = vmatmul.mubr.f32.vlgmr.msra.gmra.mrb[0].mxu1 %v2155_v53 }
 0x238   : > { %7186 = vmatpush3.msra.mxu1 %v2167_v56  ;;  %7187 = vmatprep.mubr.msk.f32.mxu1 %vm8020_vm1, %v8019_v9 }
 0x239   : > { %7190 = vmatprep.subr.mxu1 %v8019_v9 }
 0x23f   : > { %7188 = vmatmul.mubr.f32.vlgmr.msra.gmra.mrb[0].mxu1 %v2156_v55 }
 0x240   : > { %7191 = vmatpush3.msra.mxu1 %v2090_v54  ;;  %7192 = vmatprep.mubr.msk.f32.mxu1 %vm8020_vm1, %v8019_v9 }
 0x241   : > { %7195 = vmatprep.subr.mxu1 %v8019_v9 }
 0x247   : > { %7193 = vmatmul.mubr.f32.vlgmr.msra.gmra.mrb[0].mxu1 %v2157_v57 }
 0x248   : > { %7196 = vmatpush3.msra.mxu1 %v2168_v58  ;;  %7197 = vmatprep.mubr.msk.f32.mxu1 %vm8020_vm1, %v8019_v9 }
 0x249   : > { %7200 = vmatprep.subr.mxu1 %v8019_v9 }
 0x24f   : > { %7198 = vmatmul.mubr.f32.vlgmr.msra.gmra.mrb[0].mxu1 %v2155_v53 }
 0x250   : > { %7201 = vmatpush3.msra.mxu1 %v2090_v54  ;;  %7202 = vmatprep.mubr.msk.f32.mxu1 %vm8020_vm1, %v8019_v9 }
 0x251   : > { %7355 = vmatprep.subr.mxu1 %v8019_v9 }
 0x257   : > { %7203 = vmatmul.mubr.f32.vlgmr.msra.gmra.mrb[0].mxu1 %v2155_v53  ;;  %v3466_v53 = vand.u32 4294901760, %v3461_v51 }
 0x258   : > { %7356 = vmatpush3.msra.mxu1 %v8318_v4  ;;  %7357 = vmatprep.mubr.msk.f32.mxu1 %vm8020_vm1, %v8019_v9 }
 0x259   : > { %7360 = vmatprep.subr.mxu1 %v8019_v9  ;;  %v3543_v55 = vsub.f32 %v3461_v51, %v3466_v53 }
 0x25b   : > { %v3544_v57 = vand.u32 4294901760, %v3543_v55 }
 0x25d   : > { %v3545_v59 = vsub.f32 %v3543_v55, %v3544_v57 }
 0x25f   : > { %v3546_v61 = vand.u32 4294901760, %v3545_v59  ;;  %v5292_v59 = vlaneseq }
 0x32a   : > { %v2531_v5 = vpop.f32.mrb[0].mxu1 }
 0x32b   : > { %v2536_v6 = vmul.f32 0.35355338, %v2531_v5  ;;  %v7204_v7 = vpop.f32.mrb[1].mxu1  ;;  %v3919_v5 = vand.u32 4294901760, %v3914_v63 }
 0x32d   : > { %v2537_v8 = vsel %vm728_vm2, %v2536_v6, -inf  ;;  %v3996_v7 = vsub.f32 %v3914_v63, %v3919_v5 }
 0x32e   : > { %v2538_v12 = vrot.slane %v2537_v8, 4 }
 0x330   : > { %v2539_v13 = vmax.f32 %v2537_v8, %v2538_v12  ;;  %v3997_v12 = vand.u32 4294901760, %v3996_v7 }
 0x332   : > { %v2540_v14 = vrot.slane %v2539_v13, 2 }
 0x334   : > { %v2541_v15 = vmax.f32 %v2539_v13, %v2540_v14  ;;  %v3998_v13 = vsub.f32 %v3996_v7, %v3997_v12 }
 0x336   : > { %v2542_v16 = vrot.slane %v2541_v15, 1 }
 0x338   : > { %v2543_v17 = vmax.f32 %v2541_v15, %v2542_v16  ;;  %v3999_v15 = vand.u32 4294901760, %v3998_v13  ;;  %v4370_v16 = vsel %vm728_vm2, %v8310_v2, 0 }
 0x33a   : > { %v2544_v18 = vsub.f32 %v2536_v6, %v2543_v17  ;;  %v4368_v17 = vpop.permute.xlu0 %4367 }
 0x33c   : > { %v2545_v19 = vmul.f32 1.442695, %v2544_v18  ;;  %v4438_v18 = vand.u32 4294901760, %v4370_v16 }
 0x33e   : > { %7947 = vpow2.f32 %v2545_v19  ;;  %v4373_v19 = vand.u32 4294901760, %v4368_v17 }
 0x348   : > { %v7948_v20 = vpop.eup %7947 }
 0x349   : > { %v2547_v21 = vsel %vm728_vm2, %v7948_v20, 0.0 }
 0x34a   : > { %v2548_v22 = vrot.slane %v2547_v21, 4 }
 0x34c   : > { %v2549_v23 = vadd.f32 %v2548_v22, %v2547_v21  ;;  %v4450_v21 = vsub.f32 %v4368_v17, %v4373_v19 }
 0x34e   : > { %v2550_v24 = vrot.slane %v2549_v23, 2 }
 0x350   : > { %v2551_v25 = vadd.f32 %v2550_v24, %v2549_v23  ;;  %v4451_v23 = vand.u32 4294901760, %v4450_v21 }
 0x352   : > { %v2552_v26 = vrot.slane %v2551_v25, 1  ;;  %v4452_v24 = vsub.f32 %v4450_v21, %v4451_v23 }
 0x354   : > { %v2553_v27 = vadd.f32 %v2552_v26, %v2551_v25  ;;  %v4453_v26 = vand.u32 4294901760, %v4452_v24 }
 0x356   : > { %7949 = vrcp.f32 %v2553_v27 }
 0x360   : > { %v7950_v28 = vpop.eup %7949 }
 0x361   : > { %v2555_v30 = vmul.f32 %v7950_v28, %v7948_v20  ;;  %v4439_v20 = vsub.f32 %v4370_v16, %v4438_v18 }
 0x363   : > { %v2557_v31 = vsel %vm728_vm2, %v2555_v30, 0  ;;  %v4440_v22 = vand.u32 4294901760, %v4439_v20 }
 0x364   : > { %v2625_v32 = vand.u32 4294901760, %v2557_v31 }
 0x365   : > { %v4441_v2 = vsub.f32 %v4439_v20, %v4440_v22 }
 0x366   : > { %v2626_v34 = vsub.f32 %v2557_v31, %v2625_v32 }
 0x367   : > { %v4442_v25 = vand.u32 4294901760, %v4441_v2 }
 0x368   : > { %v2627_v35 = vand.u32 4294901760, %v2626_v34 }
 0x36a   : > { %v2628_v37 = vsub.f32 %v2626_v34, %v2627_v35 }
 0x36c   : > { %v2629_v38 = vand.u32 4294901760, %v2628_v37 }
 0x36e   : > { %7208 = vmatmul.mubr.f32.vlgmr.msra.gmra.mrb[2].mxu0 %v2629_v38 }
 0x36f   : > { %7211 = vmatpush3.msra.mxu0 %v2640_v39  ;;  %7212 = vmatprep.mubr.msk.f32.mxu0 %vm8020_vm1, %v8019_v9 }
 0x370   : > { %7215 = vmatprep.subr.mxu0 %v8019_v9 }
 0x376   : > { %7213 = vmatmul.mubr.f32.vlgmr.msra.gmra.mrb[2].mxu0 %v2625_v32 }
 0x377   : > { %7216 = vmatpush3.msra.mxu0 %v2637_v29  ;;  %7217 = vmatprep.mubr.msk.f32.mxu0 %vm8020_vm1, %v8019_v9 }
 0x378   : > { %7220 = vmatprep.subr.mxu0 %v8019_v9 }
 0x37e   : > { %7218 = vmatmul.mubr.f32.vlgmr.msra.gmra.mrb[2].mxu0 %v2626_v34 }
 0x37f   : > { %7221 = vmatpush3.msra.mxu0 %v8213_v11  ;;  %7222 = vmatprep.mubr.msk.f32.mxu0 %vm8020_vm1, %v8019_v9 }
 0x380   : > { %7225 = vmatprep.subr.mxu0 %v8019_v9 }
 0x386   : > { %7223 = vmatmul.mubr.f32.vlgmr.msra.gmra.mrb[2].mxu0 %v2627_v35 }
 0x387   : > { %7226 = vmatpush3.msra.mxu0 %v2638_v33  ;;  %7227 = vmatprep.mubr.msk.f32.mxu0 %vm8020_vm1, %v8019_v9 }
 0x388   : > { %7230 = vmatprep.subr.mxu0 %v8019_v9 }
 0x38e   : > { %7228 = vmatmul.mubr.f32.vlgmr.msra.gmra.mrb[2].mxu0 %v2625_v32 }
 0x38f   : > { %7231 = vmatpush3.msra.mxu0 %v8213_v11  ;;  %7232 = vmatprep.mubr.msk.f32.mxu0 %vm8020_vm1, %v8019_v9  ;;  %v3463_v11 = vsel %vm728_vm2, %v8302_v0, 0  ;;  %v3984_v0 = vand.u32 4294901760, %v3916_v62 }
 0x390   : > { %7235 = vmatprep.subr.mxu0 %v8019_v9  ;;  %v3531_v52 = vand.u32 4294901760, %v3463_v11 }
 0x391   : > { %v3985_v6 = vsub.f32 %v3916_v62, %v3984_v0 }
 0x392   : > { %v3532_v54 = vsub.f32 %v3463_v11, %v3531_v52 }
 0x393   : > { %v3986_v8 = vand.u32 4294901760, %v3985_v6 }
 0x394   : > { %v3533_v56 = vand.u32 4294901760, %v3532_v54 }
 0x395   : > { %v3987_v1 = vsub.f32 %v3985_v6, %v3986_v8 }
 0x396   : > { %7233 = vmatmul.mubr.f32.vlgmr.msra.gmra.mrb[2].mxu0 %v2625_v32  ;;  %v3534_v58 = vsub.f32 %v3532_v54, %v3533_v56 }
 0x397   : > { %7236 = vmatpush3.msra.mxu0 %v3013_v42  ;;  %7237 = vmatprep.mubr.msk.f32.mxu0 %vm8020_vm1, %v8019_v9  ;;  %v3988_v14 = vand.u32 4294901760, %v3987_v1 }
 0x398   : > { %7240 = vmatprep.subr.mxu0 %v8019_v9  ;;  %v3535_v60 = vand.u32 4294901760, %v3534_v58 }
 0x39a   : > { %7238 = vmatmul.mubr.f32.vlgmr.msra.gmra.mrb[4].mxu0 %v3082_v49  ;;  %v4924_v49 = vsub.f32 %v8315_v3, %v8318_v4  ;;  %v8036_v3 = vmov 0.0|0.0  }
 0x39b   : > { %7241 = vmatpush3.msra.mxu0 %v3093_v50  ;;  %7242 = vmatprep.mubr.msk.f32.mxu0 %vm8020_vm1, %v8019_v9 }
 0x39c   : > { %7245 = vmatprep.subr.mxu0 %v8019_v9 }
 0x3a2   : > { %7243 = vmatmul.mubr.f32.vlgmr.msra.gmra.mrb[4].mxu0 %v3078_v41 }
 0x3a3   : > { %7246 = vmatpush3.msra.mxu0 %v3090_v44  ;;  %7247 = vmatprep.mubr.msk.f32.mxu0 %vm8020_vm1, %v8019_v9 }
 0x3a4   : > { %7250 = vmatprep.subr.mxu0 %v8019_v9 }
 0x3aa   : > { %7248 = vmatmul.mubr.f32.vlgmr.msra.gmra.mrb[4].mxu0 %v3079_v43 }
 0x3ab   : > { %7251 = vmatpush3.msra.mxu0 %v3013_v42  ;;  %7252 = vmatprep.mubr.msk.f32.mxu0 %vm8020_vm1, %v8019_v9 }
 0x3ac   : > { %7255 = vmatprep.subr.mxu0 %v8019_v9 }
 0x3b2   : > { %7253 = vmatmul.mubr.f32.vlgmr.msra.gmra.mrb[4].mxu0 %v3080_v45 }
 0x3b3   : > { %7256 = vmatpush3.msra.mxu0 %v3091_v46  ;;  %7257 = vmatprep.mubr.msk.f32.mxu0 %vm8020_vm1, %v8019_v9 }
 0x3b4   : > { %7260 = vmatprep.subr.mxu0 %v8019_v9 }
 0x3ba   : > { %7258 = vmatmul.mubr.f32.vlgmr.msra.gmra.mrb[4].mxu0 %v3078_v41 }
 0x3bb   : > { %7261 = vmatpush3.msra.mxu0 %v3013_v42  ;;  %7262 = vmatprep.mubr.msk.f32.mxu0 %vm8020_vm1, %v8019_v9 }
 0x3bc   : > { %7265 = vmatprep.subr.mxu0 %v8019_v9 }
 0x3c2   : > { %7263 = vmatmul.mubr.f32.vlgmr.msra.gmra.mrb[4].mxu0 %v3078_v41 }
 0x3c3   : > { %7266 = vmatpush3.msra.mxu0 %v3466_v53  ;;  %7267 = vmatprep.mubr.msk.f32.mxu0 %vm8020_vm1, %v8019_v9 }
 0x3c4   : > { %7270 = vmatprep.subr.mxu0 %v8019_v9 }
 0x3ca   : > { %7268 = vmatmul.mubr.f32.vlgmr.msra.gmra.mrb[4].mxu0 %v3535_v60  ;;  %v5293_v60 = vshrl.u32 %v5292_v59, 7 }
 0x3cb   : > { %7271 = vmatpush3.msra.mxu0 %v3546_v61  ;;  %7272 = vmatprep.mubr.msk.f32.mxu0 %vm8020_vm1, %v8019_v9  ;;  %v5295_v61 = vand.u32 127, %v5292_v59 }
 0x3cc   : > { %7275 = vmatprep.subr.mxu0 %v8019_v9  ;;  %v5296_v62 = vmul.u32 2, %v5293_v60 }
 0x3ce   : > { %vm5297_vm3 = vcmp.eq.s32.totalorder %v5295_v61, %v5296_v62 }
 0x3cf   : > { %v6863_v63 = vsel %vm5297_vm3, 1.0, %v8019_v9 }
 0x3d2   : > { %7273 = vmatmul.mubr.f32.vlgmr.msra.gmra.mrb[4].mxu0 %v3531_v52 }
 0x3d3   : > { %7276 = vmatpush3.msra.mxu0 %v3543_v55  ;;  %7277 = vmatprep.mubr.msk.f32.mxu0 %vm8020_vm1, %v8019_v9 }
 0x3d4   : > { %7280 = vmatprep.subr.mxu0 %v8019_v9 }
 0x3da   : > { %7278 = vmatmul.mubr.f32.vlgmr.msra.gmra.mrb[4].mxu0 %v3532_v54 }
 0x3db   : > { %7281 = vmatpush3.msra.mxu0 %v3466_v53  ;;  %7282 = vmatprep.mubr.msk.f32.mxu0 %vm8020_vm1, %v8019_v9 }
 0x3dc   : > { %7285 = vmatprep.subr.mxu0 %v8019_v9 }
 0x3e2   : > { %7283 = vmatmul.mubr.f32.vlgmr.msra.gmra.mrb[4].mxu0 %v3533_v56 }
 0x3e3   : > { %7286 = vmatpush3.msra.mxu0 %v3544_v57  ;;  %7287 = vmatprep.mubr.msk.f32.mxu0 %vm8020_vm1, %v8019_v9 }
 0x3e4   : > { %7290 = vmatprep.subr.mxu0 %v8019_v9 }
 0x3ea   : > { %7288 = vmatmul.mubr.f32.vlgmr.msra.gmra.mrb[4].mxu0 %v3531_v52 }
 0x3eb   : > { %7291 = vmatpush3.msra.mxu0 %v3466_v53  ;;  %7292 = vmatprep.mubr.msk.f32.mxu0 %vm8020_vm1, %v8019_v9 }
 0x3ec   : > { %7295 = vmatprep.subr.mxu0 %v8019_v9 }
 0x3f2   : > { %7293 = vmatmul.mubr.f32.vlgmr.msra.gmra.mrb[4].mxu0 %v3531_v52  ;;  %v4925_v52 = vand.u32 4294901760, %v4924_v49 }
 0x3f3   : > { %7296 = vmatpush3.msra.mxu0 %v3919_v5  ;;  %7297 = vmatprep.mubr.msk.f32.mxu0 %vm8020_vm1, %v8019_v9 }
 0x3f4   : > { %7300 = vmatprep.subr.mxu0 %v8019_v9  ;;  %v4926_v55 = vsub.f32 %v4924_v49, %v4925_v52 }
 0x3f6   : > { %v4927_v58 = vand.u32 4294901760, %v4926_v55 }
 0x3fa   : > { %7298 = vmatmul.mubr.f32.vlgmr.msra.gmra.mrb[4].mxu0 %v3988_v14 }
 0x3fb   : > { %7301 = vmatpush3.msra.mxu0 %v3999_v15  ;;  %7302 = vmatprep.mubr.msk.f32.mxu0 %vm8020_vm1, %v8019_v9 }
 0x3fc   : > { %7305 = vmatprep.subr.mxu0 %v8019_v9 }
 0x402   : > { %7303 = vmatmul.mubr.f32.vlgmr.msra.gmra.mrb[4].mxu0 %v3984_v0 }
 0x403   : > { %7306 = vmatpush3.msra.mxu0 %v3996_v7  ;;  %7307 = vmatprep.mubr.msk.f32.mxu0 %vm8020_vm1, %v8019_v9 }
 0x404   : > { %7310 = vmatprep.subr.mxu0 %v8019_v9 }
 0x40a   : > { %7308 = vmatmul.mubr.f32.vlgmr.msra.gmra.mrb[4].mxu0 %v3985_v6 }
 0x40b   : > { %7311 = vmatpush3.msra.mxu0 %v3919_v5  ;;  %7312 = vmatprep.mubr.msk.f32.mxu0 %vm8020_vm1, %v8019_v9 }
 0x40c   : > { %7315 = vmatprep.subr.mxu0 %v8019_v9 }
 0x412   : > { %7313 = vmatmul.mubr.f32.vlgmr.msra.gmra.mrb[4].mxu0 %v3986_v8 }
 0x413   : > { %7316 = vmatpush3.msra.mxu0 %v3997_v12  ;;  %7317 = vmatprep.mubr.msk.f32.mxu0 %vm8020_vm1, %v8019_v9 }
 0x414   : > { %7320 = vmatprep.subr.mxu0 %v8019_v9 }
 0x41a   : > { %7318 = vmatmul.mubr.f32.vlgmr.msra.gmra.mrb[4].mxu0 %v3984_v0 }
 0x41b   : > { %7321 = vmatpush3.msra.mxu0 %v3919_v5  ;;  %7322 = vmatprep.mubr.msk.f32.mxu0 %vm8020_vm1, %v8019_v9 }
 0x41c   : > { %7325 = vmatprep.subr.mxu0 %v8019_v9 }
 0x422   : > { %7323 = vmatmul.mubr.f32.vlgmr.msra.gmra.mrb[4].mxu0 %v3984_v0 }
 0x423   : > { %7326 = vmatpush3.msra.mxu0 %v4373_v19  ;;  %7327 = vmatprep.mubr.msk.f32.mxu0 %vm8020_vm1, %v8019_v9 }
 0x424   : > { %7330 = vmatprep.subr.mxu0 %v8019_v9 }
 0x42a   : > { %7328 = vmatmul.mubr.f32.vlgmr.msra.gmra.mrb[4].mxu0 %v4442_v25  ;;  %v5763_v25 = vadd.s32 1, %v5296_v62 }
 0x42b   : > { %7331 = vmatpush3.msra.mxu0 %v4453_v26  ;;  %7332 = vmatprep.mubr.msk.f32.mxu0 %vm8020_vm1, %v8019_v9 }
 0x42c   : > { %7335 = vmatprep.subr.mxu0 %v8019_v9  ;;  %vm5764_vm5 = vcmp.eq.s32.totalorder %v5295_v61, %v5763_v25 }
 0x42d   : > { %v6867_v26 = vsel %vm5764_vm5, 1.0, %v8019_v9 }
 0x432   : > { %7333 = vmatmul.mubr.f32.vlgmr.msra.gmra.mrb[4].mxu0 %v4438_v18 }
 0x433   : > { %7336 = vmatpush3.msra.mxu0 %v4450_v21  ;;  %7337 = vmatprep.mubr.msk.f32.mxu0 %vm8020_vm1, %v8019_v9 }
 0x434   : > { %7340 = vmatprep.subr.mxu0 %v8019_v9 }
 0x43a   : > { %7338 = vmatmul.mubr.f32.vlgmr.msra.gmra.mrb[4].mxu0 %v4439_v20 }
 0x43b   : > { %7341 = vmatpush3.msra.mxu0 %v4373_v19  ;;  %7342 = vmatprep.mubr.msk.f32.mxu0 %vm8020_vm1, %v8019_v9 }
 0x43c   : > { %7345 = vmatprep.subr.mxu0 %v8019_v9 }
 0x442   : > { %7343 = vmatmul.mubr.f32.vlgmr.msra.gmra.mrb[4].mxu0 %v4440_v22 }
 0x443   : > { %7346 = vmatpush3.msra.mxu0 %v4451_v23  ;;  %7347 = vmatprep.mubr.msk.f32.mxu0 %vm8020_vm1, %v8019_v9 }
 0x444   : > { %7350 = vmatprep.subr.mxu0 %v8019_v9 }
 0x44a   : > { %7348 = vmatmul.mubr.f32.vlgmr.msra.gmra.mrb[4].mxu0 %v4438_v18 }
 0x44b   : > { %7351 = vmatpush3.msra.mxu0 %v4373_v19  ;;  %7352 = vmatprep.mubr.msk.f32.mxu0 %vm8020_vm1, %v8019_v9 }
 0x44c   : > { %7667 = vmatprep.subr.bf16.mxu0 %v8036_v3 }
 0x452   : > { %7353 = vmatmul.mubr.f32.vlgmr.msra.gmra.mrb[4].mxu0 %v4438_v18 }
 0x453   : > { %7485 = vmatprep.mubr.msk.f32.mxu0 %vm8020_vm1, %v8019_v9 }
 0x469   : > { %v8427_v27 = vpop.f32.mrb[2].mxu0 }
 0x46a   : > { %v7234_v28 = vpop.f32.mrb[3].mxu0  ;;  %v5305_v5 = vand.u32 4294901760, %v8427_v27 }
 0x46c   : > { %v5383_v7 = vsub.f32 %v8427_v27, %v5305_v5  ;;  %v5768_v27 = vsel %vm5300_vm4, %v6867_v26, 0 }
 0x46d   : > { %v5838_v28 = vsub.f32 %v5768_v27, %v5768_v27 }
 0x46e   : > { %v5384_v1 = vand.u32 4294901760, %v5383_v7 }
 0x470   : > { %v5385_v18 = vsub.f32 %v5383_v7, %v5384_v1 }
 0x472   : > { %v5386_v23 = vand.u32 4294901760, %v5385_v18 }
 0x525   : > { %v4814_v29 = vpop.f32.mrb[4].mxu0 }
 0x526   : > { %v4819_v30 = vmul.f32 0.35355338, %v4814_v29  ;;  %v7354_v31 = vpop.f32.mrb[5].mxu0  ;;  %v5839_v29 = vand.u32 4294901760, %v5838_v28 }
 0x528   : > { %v4820_v32 = vsel %vm728_vm2, %v4819_v30, -inf }
 0x529   : > { %v4821_v33 = vrot.slane %v4820_v32, 4 }
 0x52b   : > { %v4822_v34 = vmax.f32 %v4820_v32, %v4821_v33  ;;  %v6234_v32 = vld [vmem:[%s8671_s2] sm:$0xff]  ;;  %v6235_v33 = vld [vmem:[%s8671_s2 + $0x8] sm:$0xff] }
 0x52d   : > { %v4823_v35 = vrot.slane %v4822_v34, 2 }
 0x52f   : > { %v4824_v36 = vmax.f32 %v4822_v34, %v4823_v35  ;;  %v6236_v34 = vld [vmem:[%s8671_s2 + $0x10] sm:$0xff]  ;;  %v6247_v35 = vand.u32 4294901760, %v6234_v32 }
 0x531   : > { %v4825_v37 = vrot.slane %v4824_v36, 1 }
 0x533   : > { %v4826_v38 = vmax.f32 %v4824_v36, %v4825_v37  ;;  %v6250_v36 = vand.u32 4294901760, %v6235_v33  ;;  %v6237_v37 = vld [vmem:[%s8671_s2 + $0x18] sm:$0xff] }
 0x535   : > { %v4827_v39 = vsub.f32 %v4819_v30, %v4826_v38  ;;  %v5840_v30 = vsub.f32 %v5838_v28, %v5839_v29  ;;  %v6253_v38 = vand.u32 4294901760, %v6236_v34 }
 0x537   : > { %v4828_v10 = vmul.f32 1.442695, %v4827_v39  ;;  %v5841_v31 = vand.u32 4294901760, %v5840_v30  ;;  %v6256_v39 = vand.u32 4294901760, %v6237_v37 }
 0x539   : > { %7951 = vpow2.f32 %v4828_v10  ;;  %v8514_v10 = vpack.c.bf16 %v6250_v36, %v6247_v35 }
 0x53b   : > { %7669 = vmatpush3.bf16.msra.mxu0 %v8514_v10 }
 0x53c   : > { %7670 = vmatprep.subr.bf16.mxu0 %v8036_v3 }
 0x543   : > { %v7952_v40 = vpop.eup %7951 }
 0x544   : > { %v4830_v41 = vsel %vm728_vm2, %v7952_v40, 0.0 }
 0x545   : > { %v4831_v42 = vrot.slane %v4830_v41, 4 }
 0x547   : > { %v4832_v43 = vadd.f32 %v4831_v42, %v4830_v41  ;;  %v8518_v41 = vsub.f32 %v6235_v33, %v6250_v36  ;;  %v8520_v42 = vsub.f32 %v6236_v34, %v6253_v38 }
 0x549   : > { %v4833_v44 = vrot.slane %v4832_v43, 2  ;;  %v6339_v61 = vand.u32 4294901760, %v8518_v41 }
 0x54b   : > { %v4834_v45 = vadd.f32 %v4833_v44, %v4832_v43  ;;  %v8522_v43 = vsub.f32 %v6237_v37, %v6256_v39  ;;  %v8526_v44 = vpack.c.bf16 %v6256_v39, %v6253_v38 }
 0x54d   : > { %v4835_v46 = vrot.slane %v4834_v45, 1  ;;  %7672 = vmatpush3.bf16.msra.mxu0 %v8526_v44 }
 0x54e   : > { %7673 = vmatprep.subr.bf16.mxu0 %v8036_v3 }
 0x54f   : > { %v4836_v47 = vadd.f32 %v4835_v46, %v4834_v45 }
 0x551   : > { %7953 = vrcp.f32 %v4836_v47  ;;  %v6238_v47 = vld [vmem:[%s8671_s2 + $0x20] sm:$0xff] }
 0x55b   : > { %v7954_v48 = vpop.eup %7953 }
 0x55c   : > { %v4838_v50 = vmul.f32 %v7954_v48, %v7952_v40  ;;  %v8516_v40 = vsub.f32 %v6234_v32, %v6247_v35  ;;  %v6239_v48 = vld [vmem:[%s8671_s2 + $0x28] sm:$0xff]  ;;  %v7695_v35 = vpack.c.bf16 %v8522_v43, %v8520_v42 }
 0x55e   : > { %v4844_v11 = vsel %vm728_vm2, %v4838_v50, 0  ;;  %v6262_v50 = vand.u32 4294901760, %v6239_v48  ;;  %v6332_v60 = vand.u32 4294901760, %v8516_v40  ;;  %v7692_v34 = vpack.c.bf16 %v8518_v41, %v8516_v40 }
 0x55f   : > { %v4912_v51 = vand.u32 4294901760, %v4844_v11 }
 0x560   : > { %v7716_v62 = vpack.c.bf16 %v6339_v61, %v6332_v60 }
 0x561   : > { %v4913_v53 = vsub.f32 %v4844_v11, %v4912_v51 }
 0x563   : > { %v4914_v54 = vand.u32 4294901760, %v4913_v53 }
 0x565   : > { %v4915_v56 = vsub.f32 %v4913_v53, %v4914_v54 }
 0x567   : > { %v4916_v57 = vand.u32 4294901760, %v4915_v56 }
 0x569   : > { %7358 = vmatmul.mubr.f32.vlgmr.msra.gmra.mrb[2].mxu1 %v4916_v57  ;;  %v8558_v57 = vsub.f32 %v6239_v48, %v6262_v50 }
 0x56a   : > { %7361 = vmatpush3.msra.mxu1 %v4927_v58  ;;  %7362 = vmatprep.mubr.msk.f32.mxu1 %vm8020_vm1, %v8019_v9 }
 0x56b   : > { %7365 = vmatprep.subr.mxu1 %v8019_v9 }
 0x571   : > { %7363 = vmatmul.mubr.f32.vlgmr.msra.gmra.mrb[2].mxu1 %v4912_v51 }
 0x572   : > { %7366 = vmatpush3.msra.mxu1 %v4924_v49  ;;  %7367 = vmatprep.mubr.msk.f32.mxu1 %vm8020_vm1, %v8019_v9  ;;  %v6259_v49 = vand.u32 4294901760, %v6238_v47 }
 0x573   : > { %7370 = vmatprep.subr.mxu1 %v8019_v9 }
 0x574   : > { %v8542_v11 = vpack.c.bf16 %v6262_v50, %v6259_v49  ;;  %v8556_v56 = vsub.f32 %v6238_v47, %v6259_v49 }
 0x576   : > { %7675 = vmatpush3.bf16.msra.mxu0 %v8542_v11  ;;  %v6360_v18 = vand.u32 4294901760, %v8556_v56  ;;  %v7698_v36 = vpack.c.bf16 %v8558_v57, %v8556_v56 }
 0x577   : > { %7676 = vmatprep.subr.bf16.mxu0 %v8036_v3 }
 0x579   : > { %7368 = vmatmul.mubr.f32.vlgmr.msra.gmra.mrb[2].mxu1 %v4913_v53 }
 0x57a   : > { %7371 = vmatpush3.msra.mxu1 %v8318_v4  ;;  %7372 = vmatprep.mubr.msk.f32.mxu1 %vm8020_vm1, %v8019_v9 }
 0x57b   : > { %7375 = vmatprep.subr.mxu1 %v8019_v9 }
 0x581   : > { %7373 = vmatmul.mubr.f32.vlgmr.msra.gmra.mrb[2].mxu1 %v4914_v54 }
 0x582   : > { %7376 = vmatpush3.msra.mxu1 %v4925_v52  ;;  %7377 = vmatprep.mubr.msk.f32.mxu1 %vm8020_vm1, %v8019_v9  ;;  %v6241_v52 = vld [vmem:[%s8671_s2 + $0x38] sm:$0xff] }
 0x583   : > { %7380 = vmatprep.subr.mxu1 %v8019_v9  ;;  %v6268_v54 = vand.u32 4294901760, %v6241_v52 }
 0x585   : > { %v8562_v59 = vsub.f32 %v6241_v52, %v6268_v54 }
 0x589   : > { %7378 = vmatmul.mubr.f32.vlgmr.msra.gmra.mrb[2].mxu1 %v4912_v51 }
 0x58a   : > { %7381 = vmatpush3.msra.mxu1 %v8318_v4  ;;  %7382 = vmatprep.mubr.msk.f32.mxu1 %vm8020_vm1, %v8019_v9  ;;  %v5302_v4 = vsel %vm5300_vm4, %v6863_v63, 0 }
 0x58b   : > { %7631 = vmatprep.subr.bf16.mxu1 %v8036_v3  ;;  %v5372_v0 = vsub.f32 %v5302_v4, %v5302_v4  ;;  %v6340_v4 = vsub.f32 %v8518_v41, %v6339_v61 }
 0x58d   : > { %v5373_v6 = vand.u32 4294901760, %v5372_v0 }
 0x58f   : > { %v5374_v12 = vsub.f32 %v5372_v0, %v5373_v6 }
 0x591   : > { %7383 = vmatmul.mubr.f32.vlgmr.msra.gmra.mrb[2].mxu1 %v4912_v51  ;;  %v5375_v17 = vand.u32 4294901760, %v5374_v12  ;;  %v6240_v51 = vld [vmem:[%s8671_s2 + $0x30] sm:$0xff] }
 0x592   : > { %7389 = vmatprep.mubr.msk.f32.mxu1 %vm8020_vm1, %v8019_v9  ;;  %v6265_v53 = vand.u32 4294901760, %v6240_v51 }
 0x594   : > { %v8554_v55 = vpack.c.bf16 %v6268_v54, %v6265_v53  ;;  %v8560_v58 = vsub.f32 %v6240_v51, %v6265_v53 }
 0x596   : > { %7678 = vmatpush3.bf16.msra.mxu0 %v8554_v55  ;;  %v6374_v25 = vand.u32 4294901760, %v8560_v58  ;;  %v7701_v37 = vpack.c.bf16 %v8562_v59, %v8560_v58 }
 0x597   : > { %7679 = vmatprep.subr.bf16.mxu0 %v8036_v3 }
 0x664   : > { %v5288_v8 = vpop.f32.mrb[2].mxu1 }
 0x665   : > { %v5308_v13 = vand.u32 4294901760, %v5288_v8  ;;  %v7384_v14 = vpop.f32.mrb[3].mxu1 }
 0x667   : > { %v7632_v15 = vpack.c.bf16 %v5308_v13, %v5305_v5  ;;  %v5390_v16 = vsub.f32 %v5288_v8, %v5308_v13  ;;  %v6341_v5 = vand.u32 4294901760, %v6340_v4 }
 0x669   : > { %v5391_v19 = vand.u32 4294901760, %v5390_v16  ;;  %v7638_v20 = vpack.c.bf16 %v5390_v16, %v5383_v7  ;;  %7633 = vmatpush3.bf16.msra.mxu1 %v7632_v15  ;;  %v6353_v7 = vand.u32 4294901760, %v8522_v43 }
 0x66a   : > { %7634 = vmatprep.subr.bf16.mxu1 %v8036_v3 }
 0x66b   : > { %v5392_v21 = vsub.f32 %v5390_v16, %v5391_v19  ;;  %v7644_v22 = vpack.c.bf16 %v5391_v19, %v5384_v1  ;;  %v6354_v13 = vsub.f32 %v8522_v43, %v6353_v7  ;;  %v6367_v19 = vand.u32 4294901760, %v8558_v57 }
 0x66c   : > { %7390 = vmatmul.mubr.f32.vlgmr.msra.gmra.mrb[4].mxu1 %v5375_v17 }
 0x66d   : > { %v5393_v2 = vand.u32 4294901760, %v5392_v21  ;;  %7396 = vmatprep.mubr.msk.f32.mxu1 %vm8020_vm1, %v8019_v9  ;;  %v6355_v17 = vand.u32 4294901760, %v6354_v13  ;;  %v7722_v21 = vpack.c.bf16 %v6367_v19, %v6360_v18 }
 0x66f   : > { %v7635_v24 = vpack.c.bf16 %v5393_v2, %v5386_v23  ;;  %v6368_v23 = vsub.f32 %v8558_v57, %v6367_v19 }
 0x671   : > { %7636 = vmatpush3.bf16.msra.mxu1 %v7635_v24 }
 0x672   : > { %7637 = vmatprep.subr.bf16.mxu1 %v8036_v3 }
 0x674   : > { %7397 = vmatmul.mubr.msk.f32.vlgmr.msra.gmra.mrb[4].mxu1 %vm5300_vm4, %v6863_v63 }
 0x675   : > { %7639 = vmatpush3.bf16.msra.mxu1 %v7638_v20  ;;  %7403 = vmatprep.mubr.msk.f32.mxu1 %vm8020_vm1, %v8019_v9 }
 0x676   : > { %7640 = vmatprep.subr.bf16.mxu1 %v8036_v3 }
 0x67c   : > { %7404 = vmatmul.mubr.f32.vlgmr.msra.gmra.mrb[4].mxu1 %v5372_v0 }
 0x67d   : > { %7642 = vmatpush3.bf16.msra.mxu1 %v7632_v15  ;;  %7410 = vmatprep.mubr.msk.f32.mxu1 %vm8020_vm1, %v8019_v9 }
 0x67e   : > { %7643 = vmatprep.subr.bf16.mxu1 %v8036_v3 }
 0x684   : > { %7411 = vmatmul.mubr.f32.vlgmr.msra.gmra.mrb[4].mxu1 %v5373_v6  ;;  %v6346_v6 = vand.u32 4294901760, %v8520_v42 }
 0x685   : > { %7645 = vmatpush3.bf16.msra.mxu1 %v7644_v22  ;;  %7417 = vmatprep.mubr.msk.f32.mxu1 %vm8020_vm1, %v8019_v9 }
 0x686   : > { %7646 = vmatprep.subr.bf16.mxu1 %v8036_v3  ;;  %v7719_v12 = vpack.c.bf16 %v6353_v7, %v6346_v6  ;;  %v6347_v1 = vsub.f32 %v8520_v42, %v6346_v6 }
 0x688   : > { %v6348_v16 = vand.u32 4294901760, %v6347_v1 }
 0x68c   : > { %7418 = vmatmul.mubr.msk.f32.vlgmr.msra.gmra.mrb[4].mxu1 %vm5300_vm4, %v6863_v63 }
 0x68d   : > { %7648 = vmatpush3.bf16.msra.mxu1 %v7632_v15  ;;  %7424 = vmatprep.mubr.msk.f32.mxu1 %vm8020_vm1, %v8019_v9 }
 0x68e   : > { %7649 = vmatprep.subr.bf16.mxu1 %v8036_v3 }
 0x694   : > { %7425 = vmatmul.mubr.msk.f32.vlgmr.msra.gmra.mrb[4].mxu1 %vm5300_vm4, %v6863_v63  ;;  %v6333_v63 = vsub.f32 %v8516_v40, %v6332_v60 }
 0x695   : > { %7651 = vmatpush3.bf16.msra.mxu1 %v7632_v15  ;;  %7431 = vmatprep.mubr.msk.f32.mxu1 %vm8020_vm1, %v8019_v9 }
 0x696   : > { %7652 = vmatprep.subr.bf16.mxu1 %v8036_v3  ;;  %v6334_v0 = vand.u32 4294901760, %v6333_v63 }
 0x698   : > { %7432 = vmatmul.mubr.f32.vlgmr.msra.gmra.mrb[6].mxu1 %v5841_v31  ;;  %v7680_v8 = vpack.c.bf16 %v6341_v5, %v6334_v0 }
 0x699   : > { %7654 = vmatpush3.bf16.msra.mxu1 %v7635_v24  ;;  %7438 = vmatprep.mubr.msk.f32.mxu1 %vm8020_vm1, %v8019_v9  ;;  %v6369_v24 = vand.u32 4294901760, %v6368_v23 }
 0x69a   : > { %7655 = vmatprep.subr.bf16.mxu1 %v8036_v3 }
 0x6a0   : > { %7439 = vmatmul.mubr.msk.f32.vlgmr.msra.gmra.mrb[6].mxu1 %vm5300_vm4, %v6867_v26 }
 0x6a1   : > { %7657 = vmatpush3.bf16.msra.mxu1 %v7638_v20  ;;  %7445 = vmatprep.mubr.msk.f32.mxu1 %vm8020_vm1, %v8019_v9  ;;  %v7683_v20 = vpack.c.bf16 %v6355_v17, %v6348_v16 }
 0x6a2   : > { %7658 = vmatprep.subr.bf16.mxu1 %v8036_v3 }
 0x6a8   : > { %7446 = vmatmul.mubr.f32.vlgmr.msra.gmra.mrb[6].mxu1 %v5838_v28 }
 0x6a9   : > { %7660 = vmatpush3.bf16.msra.mxu1 %v7632_v15  ;;  %7452 = vmatprep.mubr.msk.f32.mxu1 %vm8020_vm1, %v8019_v9 }
 0x6aa   : > { %7661 = vmatprep.subr.bf16.mxu1 %v8036_v3 }
 0x6b0   : > { %7453 = vmatmul.mubr.f32.vlgmr.msra.gmra.mrb[6].mxu1 %v5839_v29  ;;  %v6375_v29 = vsub.f32 %v8560_v58, %v6374_v25 }
 0x6b1   : > { %7663 = vmatpush3.bf16.msra.mxu1 %v7644_v22  ;;  %7459 = vmatprep.mubr.msk.f32.mxu1 %vm8020_vm1, %v8019_v9  ;;  %v6361_v22 = vsub.f32 %v8556_v56, %v6360_v18 }
 0x6b2   : > { %7664 = vmatprep.subr.bf16.mxu1 %v8036_v3  ;;  %v6376_v31 = vand.u32 4294901760, %v6375_v29 }
 0x6b3   : > { %v6362_v2 = vand.u32 4294901760, %v6361_v22 }
 0x6b5   : > { %v7686_v27 = vpack.c.bf16 %v6369_v24, %v6362_v2 }
 0x6b8   : > { %7460 = vmatmul.mubr.msk.f32.vlgmr.msra.gmra.mrb[6].mxu1 %vm5300_vm4, %v6867_v26 }
 0x6b9   : > { %7666 = vmatpush3.bf16.msra.mxu1 %v7632_v15  ;;  %7466 = vmatprep.mubr.msk.f32.mxu1 %vm8020_vm1, %v8019_v9 }
 0x6ba   : > { %7703 = vmatprep.subr.bf16.mxu1 %v8036_v3 }
 0x6c0   : > { %7467 = vmatmul.mubr.msk.f32.vlgmr.msra.gmra.mrb[6].mxu1 %vm5300_vm4, %v6867_v26  ;;  %v6381_v26 = vand.u32 4294901760, %v8562_v59 }
 0x6c1   : > { %7542 = vmatprep.mubr.msk.f32.mxu1 %vm8020_vm1, %v8019_v9  ;;  %7705 = vmatpush3.bf16.msra.mxu1 %v8514_v10 }
 0x6c2   : > { %7706 = vmatprep.subr.bf16.mxu1 %v8036_v3  ;;  %v7725_v28 = vpack.c.bf16 %v6381_v26, %v6374_v25  ;;  %v6382_v30 = vsub.f32 %v8562_v59, %v6381_v26 }
 0x6c4   : > { %v6383_v32 = vand.u32 4294901760, %v6382_v30 }
 0x6c5   : > { %7708 = vmatpush3.bf16.msra.mxu1 %v8526_v44 }
 0x6c6   : > { %7709 = vmatprep.subr.bf16.mxu1 %v8036_v3  ;;  %v7689_v33 = vpack.c.bf16 %v6383_v32, %v6376_v31 }
 0x6c9   : > { %7711 = vmatpush3.bf16.msra.mxu1 %v8542_v11 }
 0x6ca   : > { %7712 = vmatprep.subr.bf16.mxu1 %v8036_v3 }
 0x6cd   : > { %7714 = vmatpush3.bf16.msra.mxu1 %v8554_v55 }
 0x6ce   : > { %7715 = vmatprep.subr.bf16.mxu1 %v8036_v3 }
 0x767   : > { %v8534_v45 = vpop.f32.mrb[4].mxu1 }
 0x768   : > { %v7426_v46 = vpop.f32.mrb[5].mxu1 }
 0x793   : > { %v6225_v14 = vpop.f32.mrb[6].mxu1 }
 0x794   : > { %6230 = vrot.lane.b32.xlu0 %v6225_v14, %s8032_s11  ;;  %v7468_v15 = vpop.f32.mrb[7].mxu1  ;;  %s159_s11 = sand.u32 1, %s8009_s13  }
 0x795   : > { %s6861_s20 = sshll.u32 %s159_s11, 3  ;;  %s6785_s30 = scalar_lea.sflag [#allocation3], %s159_s11 }
 0x796   : > { %s161_s25 = scalar_lea.vmem [#allocation2], %s6861_s20 }
 0x797   : > { %s6798_s26 = sshll.u32 %s161_s25, 4  ;;  %s8628_s26 = int_to_ptr.vmem [resolvable:$true] %s6798_s26 }
 0x798   : > { %s7955_s4 = scalar_lea.vmem %s8628_s26, 128  ;;  %p7962_p0 = scmp.lt.s32.totalorder %s8628_s26, %s7960_s5 }
 0x799   : > { %p7956_p11 = scmp.ne.s32.totalorder %s8628_s26, %s7955_s4  ;;  %p7963_p1 = scmp.lt.s32.totalorder %s7961_s6, %s7955_s4 }
 0x79b   : > { %p7957_p12 = pnand %p7956_p11, %p8096_p5  ;;  %p7964_p2 = por %p7963_p1, %p7962_p0 }
 0x79d   : > { %p7958_p13 = pneg %p7957_p12 }
 0x79f   : > { %p7965_p3 = pnand %p7964_p2, %p7958_p13 }
 0x806   : > { %v6231_v38 = vpop.permute.xlu0 %6230 }
 0x807   : > { %v6233_v39 = vsel %vm175_vm0, %v8534_v45, %v6231_v38 }
 0x808   : > { %v6244_v46 = vsel %vm6242_vm6, %v6233_v39, 0 }
 0x809   : > { %v6319_v47 = vand.u32 4294901760, %v6244_v46 }
 0x80b   : > { %v6320_v48 = vsub.f32 %v6244_v46, %v6319_v47 }
 0x80d   : > { %v6321_v49 = vand.u32 4294901760, %v6320_v48 }
 0x80f   : > { %7543 = vmatmul.mubr.f32.vlgmr.msra.gmra.mrb[8].mxu1 %v6321_v49  ;;  %v6322_v40 = vsub.f32 %v6320_v48, %v6321_v49 }
 0x810   : > { %7717 = vmatpush3.bf16.msra.mxu1 %v7716_v62  ;;  %7561 = vmatprep.mubr.msk.f32.mxu1 %vm8020_vm1, %v8019_v9 }
 0x811   : > { %7718 = vmatprep.subr.bf16.mxu1 %v8036_v3  ;;  %v6323_v41 = vand.u32 4294901760, %v6322_v40 }
 0x813   : > { %7486 = vmatmul.mubr.f32.vlgmr.msra.gmra.mrb[6].mxu0 %v6323_v41 }
 0x814   : > { %7681 = vmatpush3.bf16.msra.mxu0 %v7680_v8  ;;  %7720 = vmatpush3.bf16.msra.mxu1 %v7719_v12 }
 0x815   : > { %7682 = vmatprep.subr.bf16.mxu0 %v8036_v3  ;;  %7721 = vmatprep.subr.bf16.mxu1 %v8036_v3 }
 0x816   : > { %7504 = vmatprep.mubr.msk.f32.mxu0 %vm8020_vm1, %v8019_v9 }
 0x818   : > { %7684 = vmatpush3.bf16.msra.mxu0 %v7683_v20  ;;  %7723 = vmatpush3.bf16.msra.mxu1 %v7722_v21 }
 0x819   : > { %7685 = vmatprep.subr.bf16.mxu0 %v8036_v3  ;;  %7724 = vmatprep.subr.bf16.mxu1 %v8036_v3 }
 0x81c   : > { %7687 = vmatpush3.bf16.msra.mxu0 %v7686_v27  ;;  %7726 = vmatpush3.bf16.msra.mxu1 %v7725_v28 }
 0x81d   : > { %7688 = vmatprep.subr.bf16.mxu0 %v8036_v3  ;;  %7727 = vmatprep.subr.bf16.mxu1 %v8036_v3 }
 0x81f   : > { %7562 = vmatmul.mubr.f32.vlgmr.msra.gmra.mrb[8].mxu1 %v6319_v47 }
 0x820   : > { %7690 = vmatpush3.bf16.msra.mxu0 %v7689_v33  ;;  %7729 = vmatpush3.bf16.msra.mxu1 %v8514_v10 }
 0x821   : > { %7691 = vmatprep.subr.bf16.mxu0 %v8036_v3  ;;  %7730 = vmatprep.subr.bf16.mxu1 %v8036_v3 }
 0x822   : > { %7580 = vmatprep.mubr.msk.f32.mxu1 %vm8020_vm1, %v8019_v9 }
 0x823   : > { %7505 = vmatmul.mubr.f32.vlgmr.msra.gmra.mrb[6].mxu0 %v6319_v47 }
 0x824   : > { %7693 = vmatpush3.bf16.msra.mxu0 %v7692_v34  ;;  %7732 = vmatpush3.bf16.msra.mxu1 %v8526_v44 }
 0x825   : > { %7694 = vmatprep.subr.bf16.mxu0 %v8036_v3  ;;  %7733 = vmatprep.subr.bf16.mxu1 %v8036_v3 }
 0x826   : > { %7523 = vmatprep.mubr.msk.f32.mxu0 %vm8020_vm1, %v8019_v9 }
 0x828   : > { %7696 = vmatpush3.bf16.msra.mxu0 %v7695_v35  ;;  %7735 = vmatpush3.bf16.msra.mxu1 %v8542_v11 }
 0x829   : > { %7697 = vmatprep.subr.bf16.mxu0 %v8036_v3  ;;  %7736 = vmatprep.subr.bf16.mxu1 %v8036_v3 }
 0x82c   : > { %7699 = vmatpush3.bf16.msra.mxu0 %v7698_v36  ;;  %7738 = vmatpush3.bf16.msra.mxu1 %v8554_v55 }
 0x82d   : > { %7700 = vmatprep.subr.bf16.mxu0 %v8036_v3 }
 0x82f   : > { %7581 = vmatmul.mubr.f32.vlgmr.msra.gmra.mrb[8].mxu1 %v6319_v47 }
 0x830   : > { %7702 = vmatpush3.bf16.msra.mxu0 %v7701_v37 }
 0x833   : > { %7524 = vmatmul.mubr.f32.vlgmr.msra.gmra.mrb[6].mxu0 %v6320_v48 }
 0x902   : > { %v6779_v10 = vpop.f32.mrb[8].mxu1 }
 0x903   : > { %v7582_v9 = vpop.f32.mrb[9].mxu1 }
 0x906   : > { %v6524_v42 = vpop.f32.mrb[6].mxu0 }
 0x907   : > { %v7739_v43 = vadd.f32 %v6779_v10, %v6524_v42  ;;  %v7525_v44 = vpop.f32.mrb[7].mxu0 }
 0x909   : > { %6783 = vst.msk [vmem:[%s161_s25] sm:$0xff] %vm175_vm0, %v7739_v43 }
 0x90a   : > { %7968 = shalt.err (!%p7965_p3)
}
 0x90b   : > { %s7969_s7 = scalar_lea.hbm %s8626_s29, 128  ;;  %s7973_s10 = scalar_lea.hbm %s8672_s3, 256 }
 0x90c   : > { %p7970_p4 = scmp.ne.s32.totalorder %s8626_s29, %s7969_s7  ;;  %p7974_p9 = scmp.lt.u32.totalorder %s8626_s29, %s8672_s3 }
 0x90d   : > { %p7975_p10 = scmp.lt.u32.totalorder %s7973_s10, %s7969_s7  ;;  %p7977_p12 = scmp.lt.u32.totalorder %s7969_s7, %s8626_s29 }
 0x90e   : > { %p7971_p7 = pnand %p7970_p4, %p8096_p5 }
 0x90f   : > { %p7976_p11 = por %p7975_p10, %p7974_p9 }
 0x910   : > { %p7972_p8 = pneg %p7971_p7 }
 0x911   : > { %p7978_p13 = por %p7977_p12, %p7976_p11 }
 0x913   : > { %p7979_p0 = pnand %p7978_p13, %p7972_p8 }
 0x915   : > { %7982 = shalt.err (!%p7979_p0)
}
 0x916   : > { %7890 = dma.vmem_to_hbm [thread:$0]  (%p8096_p5), %s8628_s26, 128, %s8626_s29, %s6785_s30  }
 0x917 PF: > { %p7896_p1 = scmp.ge.s32.totalorder %s8017_s15, 2  ;;  %s6810_s11 = sand.u32 1, %s8005_s12  }
 0x918   : > { %s6811_s20 = scalar_lea.sflag [#allocation3], %s6810_s11 }
 0x919   : > { %p7893_p2 = pnand %p7896_p1, %p8100_p6 }
 0x91b   : > { %8000 = dma.done.wait (!%p7893_p2), %s6811_s20, 128  }
 0x91c   : > { %8002 = vsyncadd (!%p7893_p2), %s6811_s20, 4294967168  ;;  %p13_p3 = scmp.ge.s32.totalorder %s8083_s18, 4   ;;  %s8675_s12 = smov %s8009_s13 }
 0x91d   : > { %s8676_s13 = smov %s8013_s14  ;;  %s8677_s14 = smov %s8094_s21 }
 0x91e   : > { %s8678_s15 = smov %s8083_s18  ;;  %15 = sbr.rel (!%p13_p3) target bundleno = 3 (0x3), region = 67 }
 0x925   :  { %6816 = vsyncpa [#allocation3], 1 }
 0x926   :  { %6818 = vsyncpa [#allocation3 + $0x1], 1 }

</bundles_post_ra>
